<compile_context>
chip_gen: v5e
topology: v5e:2x2
jax: 0.10.0
libtpu: 0.0.40
codegen_flags: <defaults>
</compile_context>

<pallas_src>
import math

import numpy as np
import jax
import jax.numpy as jnp
from jax import lax
from jax.experimental import pallas as pl
from jax.experimental.pallas import tpu as pltpu

_SLAB = 8  # points per sublane group


def _splat_kernel(idx_ref, lc_ref, feat_ref, out_ref):
    # idx/lc: [Nc, V]; feat: [Nc, F]; out: [F, Gt] (resident across N chunks,
    # which form the last grid axis).
    g_tile = pl.program_id(2)
    n_step = pl.program_id(3)

    @pl.when(n_step == 0)
    def _():
        # scatter_max into a zero-initialised buffer -> empty cells are 0 and
        # occupied cells are clamped at >= 0.
        out_ref[...] = jnp.zeros_like(out_ref)

    Nc, V = idx_ref.shape
    F = feat_ref.shape[-1]
    Gt = out_ref.shape[-1]
    n_slabs = Nc // _SLAB

    # Lane iota over this G tile; hoisted out of the slab loop.
    g_ids = lax.broadcasted_iota(jnp.int32, (_SLAB, Gt), 1) + g_tile * Gt

    def slab_body(s, acc):
        acc = list(acc)
        off = pl.multiple_of(s * _SLAB, _SLAB)
        idx_slab = idx_ref[pl.ds(off, _SLAB), :]            # [8, V] i32
        lc_slab = lc_ref[pl.ds(off, _SLAB), :]              # [8, V] f32
        ft_slab = feat_ref[pl.ds(off, _SLAB), :]            # [8, F] f32
        ft_cols = [ft_slab[:, f:f + 1] for f in range(F)]   # [8, 1] each
        for v in range(V):                                  # static unroll (4 or 8)
            # [8, Gt]: idx column (lane-broadcast) vs. lane iota.
            hit = idx_slab[:, v:v + 1] == g_ids
            lc_v = lc_slab[:, v:v + 1]                      # [8, 1]
            for f in range(F):
                src = ft_cols[f] * lc_v                     # [8, 1]
                # Zero fill (not -inf): numerically identical given the
                # zero-initialised accumulator -> pure select + max stream.
                acc[f] = jnp.maximum(acc[f], jnp.where(hit, src, 0.0))
        return tuple(acc)

    acc0 = tuple(jnp.zeros((_SLAB, Gt), jnp.float32) for _ in range(F))
    acc = lax.fori_loop(0, n_slabs, slab_body, acc0)

    # One small 8-row sublane reduce per grid step, folded into the resident tile.
    reduced = jnp.max(jnp.stack(acc, axis=0), axis=1)       # [F, Gt]
    out_ref[...] = jnp.maximum(out_ref[...], reduced)


def _round_up(x, m):
    return ((x + m - 1) // m) * m


def _pick_g_tile(g_pad, cap):
    # Largest multiple of 128 <= cap that divides g_pad (g_pad is a multiple of
    # 128, so 128 always works).
    if g_pad <= cap:
        return g_pad
    best = 128
    t = 256
    while t <= cap:
        if g_pad % t == 0:
            best = t
        t += 128
    return best


def _vmem_limit_bytes():
    # v5e/v6e have 128 MiB of VMEM per TensorCore, v7x only 64 MiB; stay at or
    # below half the physical capacity and never above 48 MiB.
    cap = 128 * 1024 * 1024
    try:
        cap = int(pltpu.get_tpu_info().vmem_capacity_bytes)
    except Exception:
        pass
    return int(min(cap // 2, 48 * 1024 * 1024))


def splat(local_coordinate, flattened_index, features, *, tensor_size, heads,
          pts_padding=None, max_g_tile=None):
    """Pallas Splat forward.

    local_coordinate : f32 [B, heads, V, N]
    flattened_index  : int [B, heads, V, N]  (values in [0, prod(tensor_size)))
    features         : f32 [B, heads*F, N]
    pts_padding      : optional f32 [B, N]
    returns          : f32 [B, heads*F, *tensor_size]
    """
    B, H, V, N = local_coordinate.shape
    assert H == heads
    C = features.shape[1]
    assert C % heads == 0
    F = C // heads
    if isinstance(tensor_size, int):
        tensor_size = (tensor_size,) * (3 if V == 8 else 2)
    G = int(np.prod(tensor_size))
    G_pad = _round_up(G, 128)

    # --- tiling --------------------------------------------------------------
    # G tile (lane axis): keep the whole padded grid resident whenever the
    # sublane-expanded accumulator [F, 8, Gt] stays within ~4 MiB so the point
    # stream is read from HBM exactly once; otherwise split into 128-multiple
    # tiles dividing G_pad.
    gt_cap = max(128, ((4 * 1024 * 1024) // (4 * _SLAB * max(F, 1))) // 128 * 128)
    cap = min(gt_cap, 32768) if max_g_tile is None else min(gt_cap, max_g_tile)
    Gt = _pick_g_tile(G_pad, cap)
    # N chunk (sublane axis): multiple of the 8-point slab, <= 1024, chosen to
    # minimise padding.
    n8 = _round_up(N, _SLAB)
    n_chunks = max(1, math.ceil(n8 / 1024))
    Nc = _round_up(math.ceil(n8 / n_chunks), _SLAB)
    N_pad = Nc * n_chunks

    # --- prepare inputs (f32, point index moved to the sublane axis) ---------
    feat = features.reshape(B, heads, F, N).astype(jnp.float32)
    if pts_padding is not None:
        feat = feat * pts_padding.astype(jnp.float32)[:, None, None, :]
    feat_t = jnp.transpose(feat, (0, 1, 3, 2))                        # [B,H,N,F]
    lc_t = jnp.transpose(local_coordinate.astype(jnp.float32), (0, 1, 3, 2))
    idx_t = jnp.transpose(flattened_index.astype(jnp.int32), (0, 1, 3, 2))

    if N_pad != N:
        pn = N_pad - N
        # Padded points carry feat = 0 -> src = 0, absorbed by the >= 0 clamp.
        pad4 = ((0, 0), (0, 0), (0, pn), (0, 0))
        idx_t = jnp.pad(idx_t, pad4)
        lc_t = jnp.pad(lc_t, pad4)
        feat_t = jnp.pad(feat_t, pad4)

    grid = (B, heads, G_pad // Gt, N_pad // Nc)

    # TODO(synk): for large sparse grids, pre-sort flattened_index outside the
    # kernel and scalar-prefetch per-(G-tile, N-chunk) start/count offsets so
    # empty tile pairs are skipped; the dense formulation is O(F*G*N*V).
    # TODO(synk): optional bf16 select/max datapath (v6e/v7x only) for ~2x VPU
    # throughput, gated behind a flag since it changes low-order bits vs f32.
    out = pl.pallas_call(
        _splat_kernel,
        out_shape=jax.ShapeDtypeStruct((B, heads, F, G_pad), jnp.float32),
        grid_spec=pltpu.PrefetchScalarGridSpec(
            num_scalar_prefetch=0,
            grid=grid,
            in_specs=[
                pl.BlockSpec((None, None, Nc, V), lambda b, h, g, n: (b, h, n, 0)),
                pl.BlockSpec((None, None, Nc, V), lambda b, h, g, n: (b, h, n, 0)),
                pl.BlockSpec((None, None, Nc, F), lambda b, h, g, n: (b, h, n, 0)),
            ],
            out_specs=pl.BlockSpec((None, None, F, Gt),
                                   lambda b, h, g, n: (b, h, 0, g)),
        ),
        compiler_params=pltpu.CompilerParams(
            dimension_semantics=("parallel", "parallel", "parallel", "arbitrary"),
            vmem_limit_bytes=_vmem_limit_bytes(),
        ),
    )(idx_t, lc_t, feat_t)

    out = out[..., :G]
    return out.reshape(B, heads * F, *tensor_size)


def splat_reference_numpy(lc, idx, features, tensor_size, heads, pts_padding=None):
    """Slow numpy reference reproducing torch_scatter.scatter_max into zeros."""
    lc = np.asarray(lc, np.float32)
    idx = np.asarray(idx, np.int64)
    features = np.asarray(features, np.float32)
    B, H, V, N = lc.shape
    F = features.shape[1] // heads
    G = int(np.prod(tensor_size))
    feat = features.reshape(B, heads, F, N)
    if pts_padding is not None:
        feat = feat * np.asarray(pts_padding, np.float32)[:, None, None, :]
    src = (feat[:, :, :, None, :] * lc[:, :, None, :, :]).reshape(B, heads, F, V * N)
    idxk = idx.reshape(B, heads, V * N)
    out = np.zeros((B, heads, F, G), np.float32)
    for b in range(B):
        for h in range(heads):
            for k in range(V * N):
                g = int(idxk[b, h, k])
                out[b, h, :, g] = np.maximum(out[b, h, :, g], src[b, h, :, k])
    return out.reshape(B, heads * F, *tensor_size)


if __name__ == "__main__":
    key = jax.random.PRNGKey(0)

    # --- test 1: small shapes, dim=3 (spread_size V = 8), with pts_padding ---
    B, heads, F, N, V = 2, 4, 8, 16, 8
    tensor_size = (4, 4, 4)
    G = int(np.prod(tensor_size))
    k1, k2, k3, k4 = jax.random.split(key, 4)
    lc = jax.random.uniform(k1, (B, heads, V, N), dtype=jnp.float32)
    fi = jax.random.randint(k2, (B, heads, V, N), 0, G, dtype=jnp.int32)
    feats = jax.random.normal(k3, (B, heads * F, N), dtype=jnp.float32)
    pts_pad = (jax.random.uniform(k4, (B, N)) > 0.2).astype(jnp.float32)

    z = splat(lc, fi, feats, tensor_size=tensor_size, heads=heads,
              pts_padding=pts_pad)
    z = jax.block_until_ready(z)
    assert z.shape == (B, heads * F, *tensor_size), z.shape
    z_ref = splat_reference_numpy(lc, fi, feats, tensor_size, heads, pts_pad)
    np.testing.assert_allclose(np.asarray(z), z_ref, rtol=1e-5, atol=1e-5)

    # --- test 2: non-cubic grid, G padding, F not a multiple of 8 ------------
    B2, heads2, F2, N2, V2 = 1, 2, 4, 300, 8
    tensor_size2 = (8, 8, 10)           # G = 640
    G2 = int(np.prod(tensor_size2))
    j1, j2, j3 = jax.random.split(jax.random.PRNGKey(1), 3)
    lc2 = jax.random.uniform(j1, (B2, heads2, V2, N2), dtype=jnp.float32)
    fi2 = jax.random.randint(j2, (B2, heads2, V2, N2), 0, G2, dtype=jnp.int32)
    feats2 = jax.random.normal(j3, (B2, heads2 * F2, N2), dtype=jnp.float32)

    z2 = splat(lc2, fi2, feats2, tensor_size=tensor_size2, heads=heads2)
    z2 = jax.block_until_ready(z2)
    assert z2.shape == (B2, heads2 * F2, *tensor_size2), z2.shape
    z2_ref = splat_reference_numpy(lc2, fi2, feats2, tensor_size2, heads2)
    np.testing.assert_allclose(np.asarray(z2), z2_ref, rtol=1e-5, atol=1e-5)

    # --- test 3: multiple N chunks + multiple G tiles (forced small Gt) ------
    B3, heads3, F3, N3, V3 = 1, 2, 4, 1100, 8
    tensor_size3 = (4, 8, 8)            # G = 256 -> two 128-wide G tiles
    G3 = int(np.prod(tensor_size3))
    m1, m2, m3 = jax.random.split(jax.random.PRNGKey(2), 3)
    lc3 = jax.random.uniform(m1, (B3, heads3, V3, N3), dtype=jnp.float32)
    fi3 = jax.random.randint(m2, (B3, heads3, V3, N3), 0, G3, dtype=jnp.int32)
    feats3 = jax.random.normal(m3, (B3, heads3 * F3, N3), dtype=jnp.float32)

    z3 = splat(lc3, fi3, feats3, tensor_size=tensor_size3, heads=heads3,
               max_g_tile=128)
    z3 = jax.block_until_ready(z3)
    assert z3.shape == (B3, heads3 * F3, *tensor_size3), z3.shape
    z3_ref = splat_reference_numpy(lc3, fi3, feats3, tensor_size3, heads3)
    np.testing.assert_allclose(np.asarray(z3), z3_ref, rtol=1e-5, atol=1e-5)

    print("KERNEL_OK")
</pallas_src>

<mosaic_0001>
module attributes {stable_mosaic.version = 11 : i64} {
  func.func @_splat_kernel(%arg0: i32, %arg1: i32, %arg2: i32, %arg3: i32, %arg4: memref<1x1x16x8xi32, #tpu.memory_space<vmem>>, %arg5: memref<1x1x16x8xf32, #tpu.memory_space<vmem>>, %arg6: memref<1x1x16x8xf32, #tpu.memory_space<vmem>>, %arg7: memref<1x1x8x128xf32, #tpu.memory_space<vmem>>) attributes {dimension_semantics = [#tpu.dimension_semantics<parallel>, #tpu.dimension_semantics<parallel>, #tpu.dimension_semantics<parallel>, #tpu.dimension_semantics<arbitrary>], iteration_bounds = array<i64: 2, 4, 1, 1>, scalar_prefetch = 0 : i64, scratch_operands = 0 : i64, tpu.core_type = #tpu.core_type<tc>, window_params = [{transform_indices = @transform_0, window_bounds = array<i64: 1, 1, 16, 8>}, {transform_indices = @transform_1, window_bounds = array<i64: 1, 1, 16, 8>}, {transform_indices = @transform_2, window_bounds = array<i64: 1, 1, 16, 8>}, {transform_indices = @transform_3, window_bounds = array<i64: 1, 1, 8, 128>}]} {
    %c0_i32 = arith.constant 0 : i32
    %0 = arith.cmpi eq, %arg3, %c0_i32 : i32
    %1 = arith.extui %0 : i1 to i32
    %c0_i32_0 = arith.constant 0 : i32
    %2 = arith.cmpi ne, %1, %c0_i32_0 : i32
    scf.if %2 {
      %cst_18 = arith.constant 0.000000e+00 : f32
      %33 = vector.broadcast %cst_18 : f32 to vector<8x128xf32>
      %c0_19 = arith.constant 0 : index
      %c0_20 = arith.constant 0 : index
      %c0_21 = arith.constant 0 : index
      %c0_22 = arith.constant 0 : index
      %34 = vector.load %arg7[%c0_19, %c0_20, %c0_21, %c0_22] : memref<1x1x8x128xf32, #tpu.memory_space<vmem>>, vector<1x1x8x128xf32>
      %35 = vector.shape_cast %34 : vector<1x1x8x128xf32> to vector<8x128xf32>
      %36 = vector.shape_cast %33 : vector<8x128xf32> to vector<1x1x8x128xf32>
      tpu.vector_store %arg7[%c0_19, %c0_20, %c0_21, %c0_22], %36 {strides = array<i32>} : memref<1x1x8x128xf32, #tpu.memory_space<vmem>>, vector<1x1x8x128xf32>,
    } else {
    }
    %3 = tpu.iota {dimensions = array<i32: 1>} : vector<8x128xi32>
    %c128_i32 = arith.constant 128 : i32
    %4 = arith.muli %arg2, %c128_i32 : i32
    %5 = vector.broadcast %4 : i32 to vector<8x128xi32>
    %6 = arith.addi %3, %5 : vector<8x128xi32>
    %cst = arith.constant 0.000000e+00 : f32
    %7 = vector.broadcast %cst : f32 to vector<8x128xf32>
    %cst_1 = arith.constant 0.000000e+00 : f32
    %8 = vector.broadcast %cst_1 : f32 to vector<8x128xf32>
    %cst_2 = arith.constant 0.000000e+00 : f32
    %9 = vector.broadcast %cst_2 : f32 to vector<8x128xf32>
    %cst_3 = arith.constant 0.000000e+00 : f32
    %10 = vector.broadcast %cst_3 : f32 to vector<8x128xf32>
    %cst_4 = arith.constant 0.000000e+00 : f32
    %11 = vector.broadcast %cst_4 : f32 to vector<8x128xf32>
    %cst_5 = arith.constant 0.000000e+00 : f32
    %12 = vector.broadcast %cst_5 : f32 to vector<8x128xf32>
    %cst_6 = arith.constant 0.000000e+00 : f32
    %13 = vector.broadcast %cst_6 : f32 to vector<8x128xf32>
    %cst_7 = arith.constant 0.000000e+00 : f32
    %14 = vector.broadcast %cst_7 : f32 to vector<8x128xf32>
    %c0_i32_8 = arith.constant 0 : i32
    %c2_i32 = arith.constant 2 : i32
    %15 = arith.addi %c0_i32_8, %c2_i32 : i32
    %c1_i32 = arith.constant 1 : i32
    %16:8 = scf.for %arg8 = %c0_i32_8 to %15 step %c1_i32 iter_args(%arg9 = %7, %arg10 = %8, %arg11 = %9, %arg12 = %10, %arg13 = %11, %arg14 = %12, %arg15 = %13, %arg16 = %14) -> (vector<8x128xf32>, vector<8x128xf32>, vector<8x128xf32>, vector<8x128xf32>, vector<8x128xf32>, vector<8x128xf32>, vector<8x128xf32>, vector<8x128xf32>)  : i32 {
      %c8_i32 = arith.constant 8 : i32
      %33 = arith.muli %arg8, %c8_i32 : i32
      %34 = tpu.assume_multiple %33, 8 : i32
      %c0_18 = arith.constant 0 : index
      %c0_19 = arith.constant 0 : index
      %35 = arith.index_cast %34 : i32 to index
      %c0_20 = arith.constant 0 : index
      %36 = vector.load %arg4[%c0_18, %c0_19, %35, %c0_20] : memref<1x1x16x8xi32, #tpu.memory_space<vmem>>, vector<1x1x8x8xi32>
      %37 = vector.shape_cast %36 : vector<1x1x8x8xi32> to vector<8x8xi32>
      %c0_21 = arith.constant 0 : index
      %c0_22 = arith.constant 0 : index
      %38 = arith.index_cast %34 : i32 to index
      %c0_23 = arith.constant 0 : index
      %39 = vector.load %arg5[%c0_21, %c0_22, %38, %c0_23] : memref<1x1x16x8xf32, #tpu.memory_space<vmem>>, vector<1x1x8x8xf32>
      %40 = vector.shape_cast %39 : vector<1x1x8x8xf32> to vector<8x8xf32>
      %c0_24 = arith.constant 0 : index
      %c0_25 = arith.constant 0 : index
      %41 = arith.index_cast %34 : i32 to index
      %c0_26 = arith.constant 0 : index
      %42 = vector.load %arg6[%c0_24, %c0_25, %41, %c0_26] : memref<1x1x16x8xf32, #tpu.memory_space<vmem>>, vector<1x1x8x8xf32>
      %43 = vector.shape_cast %42 : vector<1x1x8x8xf32> to vector<8x8xf32>
      %44 = vector.extract_strided_slice %43 {offsets = [0, 0], sizes = [8, 1], strides = [1, 1]} : vector<8x8xf32> to vector<8x1xf32>
      %45 = vector.extract_strided_slice %43 {offsets = [0, 1], sizes = [8, 1], strides = [1, 1]} : vector<8x8xf32> to vector<8x1xf32>
      %46 = vector.extract_strided_slice %43 {offsets = [0, 2], sizes = [8, 1], strides = [1, 1]} : vector<8x8xf32> to vector<8x1xf32>
      %47 = vector.extract_strided_slice %43 {offsets = [0, 3], sizes = [8, 1], strides = [1, 1]} : vector<8x8xf32> to vector<8x1xf32>
      %48 = vector.extract_strided_slice %43 {offsets = [0, 4], sizes = [8, 1], strides = [1, 1]} : vector<8x8xf32> to vector<8x1xf32>
      %49 = vector.extract_strided_slice %43 {offsets = [0, 5], sizes = [8, 1], strides = [1, 1]} : vector<8x8xf32> to vector<8x1xf32>
      %50 = vector.extract_strided_slice %43 {offsets = [0, 6], sizes = [8, 1], strides = [1, 1]} : vector<8x8xf32> to vector<8x1xf32>
      %51 = vector.extract_strided_slice %43 {offsets = [0, 7], sizes = [8, 1], strides = [1, 1]} : vector<8x8xf32> to vector<8x1xf32>
      %52 = vector.extract_strided_slice %37 {offsets = [0, 0], sizes = [8, 1], strides = [1, 1]} : vector<8x8xi32> to vector<8x1xi32>
      %53 = vector.broadcast %52 : vector<8x1xi32> to vector<8x128xi32>
      %54 = arith.cmpi eq, %53, %6 : vector<8x128xi32>
      %55 = vector.extract_strided_slice %40 {offsets = [0, 0], sizes = [8, 1], strides = [1, 1]} : vector<8x8xf32> to vector<8x1xf32>
      %56 = arith.mulf %44, %55 : vector<8x1xf32>
      %cst_27 = arith.constant 0.000000e+00 : f32
      %57 = vector.shape_cast %56 : vector<8x1xf32> to vector<8x1xf32>
      %58 = vector.broadcast %57 : vector<8x1xf32> to vector<8x128xf32>
      %59 = vector.broadcast %cst_27 : f32 to vector<8x128xf32>
      %60 = arith.select %54, %58, %59 : vector<8x128xi1>, vector<8x128xf32>
      %61 = arith.maximumf %arg9, %60 : vector<8x128xf32>
      %62 = arith.mulf %45, %55 : vector<8x1xf32>
      %cst_28 = arith.constant 0.000000e+00 : f32
      %63 = vector.shape_cast %62 : vector<8x1xf32> to vector<8x1xf32>
      %64 = vector.broadcast %63 : vector<8x1xf32> to vector<8x128xf32>
      %65 = vector.broadcast %cst_28 : f32 to vector<8x128xf32>
      %66 = arith.select %54, %64, %65 : vector<8x128xi1>, vector<8x128xf32>
      %67 = arith.maximumf %arg10, %66 : vector<8x128xf32>
      %68 = arith.mulf %46, %55 : vector<8x1xf32>
      %cst_29 = arith.constant 0.000000e+00 : f32
      %69 = vector.shape_cast %68 : vector<8x1xf32> to vector<8x1xf32>
      %70 = vector.broadcast %69 : vector<8x1xf32> to vector<8x128xf32>
      %71 = vector.broadcast %cst_29 : f32 to vector<8x128xf32>
      %72 = arith.select %54, %70, %71 : vector<8x128xi1>, vector<8x128xf32>
      %73 = arith.maximumf %arg11, %72 : vector<8x128xf32>
      %74 = arith.mulf %47, %55 : vector<8x1xf32>
      %cst_30 = arith.constant 0.000000e+00 : f32
      %75 = vector.shape_cast %74 : vector<8x1xf32> to vector<8x1xf32>
      %76 = vector.broadcast %75 : vector<8x1xf32> to vector<8x128xf32>
      %77 = vector.broadcast %cst_30 : f32 to vector<8x128xf32>
      %78 = arith.select %54, %76, %77 : vector<8x128xi1>, vector<8x128xf32>
      %79 = arith.maximumf %arg12, %78 : vector<8x128xf32>
      %80 = arith.mulf %48, %55 : vector<8x1xf32>
      %cst_31 = arith.constant 0.000000e+00 : f32
      %81 = vector.shape_cast %80 : vector<8x1xf32> to vector<8x1xf32>
      %82 = vector.broadcast %81 : vector<8x1xf32> to vector<8x128xf32>
      %83 = vector.broadcast %cst_31 : f32 to vector<8x128xf32>
      %84 = arith.select %54, %82, %83 : vector<8x128xi1>, vector<8x128xf32>
      %85 = arith.maximumf %arg13, %84 : vector<8x128xf32>
      %86 = arith.mulf %49, %55 : vector<8x1xf32>
      %cst_32 = arith.constant 0.000000e+00 : f32
      %87 = vector.shape_cast %86 : vector<8x1xf32> to vector<8x1xf32>
      %88 = vector.broadcast %87 : vector<8x1xf32> to vector<8x128xf32>
      %89 = vector.broadcast %cst_32 : f32 to vector<8x128xf32>
      %90 = arith.select %54, %88, %89 : vector<8x128xi1>, vector<8x128xf32>
      %91 = arith.maximumf %arg14, %90 : vector<8x128xf32>
      %92 = arith.mulf %50, %55 : vector<8x1xf32>
      %cst_33 = arith.constant 0.000000e+00 : f32
      %93 = vector.shape_cast %92 : vector<8x1xf32> to vector<8x1xf32>
      %94 = vector.broadcast %93 : vector<8x1xf32> to vector<8x128xf32>
      %95 = vector.broadcast %cst_33 : f32 to vector<8x128xf32>
      %96 = arith.select %54, %94, %95 : vector<8x128xi1>, vector<8x128xf32>
      %97 = arith.maximumf %arg15, %96 : vector<8x128xf32>
      %98 = arith.mulf %51, %55 : vector<8x1xf32>
      %cst_34 = arith.constant 0.000000e+00 : f32
      %99 = vector.shape_cast %98 : vector<8x1xf32> to vector<8x1xf32>
      %100 = vector.broadcast %99 : vector<8x1xf32> to vector<8x128xf32>
      %101 = vector.broadcast %cst_34 : f32 to vector<8x128xf32>
      %102 = arith.select %54, %100, %101 : vector<8x128xi1>, vector<8x128xf32>
      %103 = arith.maximumf %arg16, %102 : vector<8x128xf32>
      %104 = vector.extract_strided_slice %37 {offsets = [0, 1], sizes = [8, 1], strides = [1, 1]} : vector<8x8xi32> to vector<8x1xi32>
      %105 = vector.broadcast %104 : vector<8x1xi32> to vector<8x128xi32>
      %106 = arith.cmpi eq, %105, %6 : vector<8x128xi32>
      %107 = vector.extract_strided_slice %40 {offsets = [0, 1], sizes = [8, 1], strides = [1, 1]} : vector<8x8xf32> to vector<8x1xf32>
      %108 = arith.mulf %44, %107 : vector<8x1xf32>
      %cst_35 = arith.constant 0.000000e+00 : f32
      %109 = vector.shape_cast %108 : vector<8x1xf32> to vector<8x1xf32>
      %110 = vector.broadcast %109 : vector<8x1xf32> to vector<8x128xf32>
      %111 = vector.broadcast %cst_35 : f32 to vector<8x128xf32>
      %112 = arith.select %106, %110, %111 : vector<8x128xi1>, vector<8x128xf32>
      %113 = arith.maximumf %61, %112 : vector<8x128xf32>
      %114 = arith.mulf %45, %107 : vector<8x1xf32>
      %cst_36 = arith.constant 0.000000e+00 : f32
      %115 = vector.shape_cast %114 : vector<8x1xf32> to vector<8x1xf32>
      %116 = vector.broadcast %115 : vector<8x1xf32> to vector<8x128xf32>
      %117 = vector.broadcast %cst_36 : f32 to vector<8x128xf32>
      %118 = arith.select %106, %116, %117 : vector<8x128xi1>, vector<8x128xf32>
      %119 = arith.maximumf %67, %118 : vector<8x128xf32>
      %120 = arith.mulf %46, %107 : vector<8x1xf32>
      %cst_37 = arith.constant 0.000000e+00 : f32
      %121 = vector.shape_cast %120 : vector<8x1xf32> to vector<8x1xf32>
      %122 = vector.broadcast %121 : vector<8x1xf32> to vector<8x128xf32>
      %123 = vector.broadcast %cst_37 : f32 to vector<8x128xf32>
      %124 = arith.select %106, %122, %123 : vector<8x128xi1>, vector<8x128xf32>
      %125 = arith.maximumf %73, %124 : vector<8x128xf32>
      %126 = arith.mulf %47, %107 : vector<8x1xf32>
      %cst_38 = arith.constant 0.000000e+00 : f32
      %127 = vector.shape_cast %126 : vector<8x1xf32> to vector<8x1xf32>
      %128 = vector.broadcast %127 : vector<8x1xf32> to vector<8x128xf32>
      %129 = vector.broadcast %cst_38 : f32 to vector<8x128xf32>
      %130 = arith.select %106, %128, %129 : vector<8x128xi1>, vector<8x128xf32>
      %131 = arith.maximumf %79, %130 : vector<8x128xf32>
      %132 = arith.mulf %48, %107 : vector<8x1xf32>
      %cst_39 = arith.constant 0.000000e+00 : f32
      %133 = vector.shape_cast %132 : vector<8x1xf32> to vector<8x1xf32>
      %134 = vector.broadcast %133 : vector<8x1xf32> to vector<8x128xf32>
      %135 = vector.broadcast %cst_39 : f32 to vector<8x128xf32>
      %136 = arith.select %106, %134, %135 : vector<8x128xi1>, vector<8x128xf32>
      %137 = arith.maximumf %85, %136 : vector<8x128xf32>
      %138 = arith.mulf %49, %107 : vector<8x1xf32>
      %cst_40 = arith.constant 0.000000e+00 : f32
      %139 = vector.shape_cast %138 : vector<8x1xf32> to vector<8x1xf32>
      %140 = vector.broadcast %139 : vector<8x1xf32> to vector<8x128xf32>
      %141 = vector.broadcast %cst_40 : f32 to vector<8x128xf32>
      %142 = arith.select %106, %140, %141 : vector<8x128xi1>, vector<8x128xf32>
      %143 = arith.maximumf %91, %142 : vector<8x128xf32>
      %144 = arith.mulf %50, %107 : vector<8x1xf32>
      %cst_41 = arith.constant 0.000000e+00 : f32
      %145 = vector.shape_cast %144 : vector<8x1xf32> to vector<8x1xf32>
      %146 = vector.broadcast %145 : vector<8x1xf32> to vector<8x128xf32>
      %147 = vector.broadcast %cst_41 : f32 to vector<8x128xf32>
      %148 = arith.select %106, %146, %147 : vector<8x128xi1>, vector<8x128xf32>
      %149 = arith.maximumf %97, %148 : vector<8x128xf32>
      %150 = arith.mulf %51, %107 : vector<8x1xf32>
      %cst_42 = arith.constant 0.000000e+00 : f32
      %151 = vector.shape_cast %150 : vector<8x1xf32> to vector<8x1xf32>
      %152 = vector.broadcast %151 : vector<8x1xf32> to vector<8x128xf32>
      %153 = vector.broadcast %cst_42 : f32 to vector<8x128xf32>
      %154 = arith.select %106, %152, %153 : vector<8x128xi1>, vector<8x128xf32>
      %155 = arith.maximumf %103, %154 : vector<8x128xf32>
      %156 = vector.extract_strided_slice %37 {offsets = [0, 2], sizes = [8, 1], strides = [1, 1]} : vector<8x8xi32> to vector<8x1xi32>
      %157 = vector.broadcast %156 : vector<8x1xi32> to vector<8x128xi32>
      %158 = arith.cmpi eq, %157, %6 : vector<8x128xi32>
      %159 = vector.extract_strided_slice %40 {offsets = [0, 2], sizes = [8, 1], strides = [1, 1]} : vector<8x8xf32> to vector<8x1xf32>
      %160 = arith.mulf %44, %159 : vector<8x1xf32>
      %cst_43 = arith.constant 0.000000e+00 : f32
      %161 = vector.shape_cast %160 : vector<8x1xf32> to vector<8x1xf32>
      %162 = vector.broadcast %161 : vector<8x1xf32> to vector<8x128xf32>
      %163 = vector.broadcast %cst_43 : f32 to vector<8x128xf32>
      %164 = arith.select %158, %162, %163 : vector<8x128xi1>, vector<8x128xf32>
      %165 = arith.maximumf %113, %164 : vector<8x128xf32>
      %166 = arith.mulf %45, %159 : vector<8x1xf32>
      %cst_44 = arith.constant 0.000000e+00 : f32
      %167 = vector.shape_cast %166 : vector<8x1xf32> to vector<8x1xf32>
      %168 = vector.broadcast %167 : vector<8x1xf32> to vector<8x128xf32>
      %169 = vector.broadcast %cst_44 : f32 to vector<8x128xf32>
      %170 = arith.select %158, %168, %169 : vector<8x128xi1>, vector<8x128xf32>
      %171 = arith.maximumf %119, %170 : vector<8x128xf32>
      %172 = arith.mulf %46, %159 : vector<8x1xf32>
      %cst_45 = arith.constant 0.000000e+00 : f32
      %173 = vector.shape_cast %172 : vector<8x1xf32> to vector<8x1xf32>
      %174 = vector.broadcast %173 : vector<8x1xf32> to vector<8x128xf32>
      %175 = vector.broadcast %cst_45 : f32 to vector<8x128xf32>
      %176 = arith.select %158, %174, %175 : vector<8x128xi1>, vector<8x128xf32>
      %177 = arith.maximumf %125, %176 : vector<8x128xf32>
      %178 = arith.mulf %47, %159 : vector<8x1xf32>
      %cst_46 = arith.constant 0.000000e+00 : f32
      %179 = vector.shape_cast %178 : vector<8x1xf32> to vector<8x1xf32>
      %180 = vector.broadcast %179 : vector<8x1xf32> to vector<8x128xf32>
      %181 = vector.broadcast %cst_46 : f32 to vector<8x128xf32>
      %182 = arith.select %158, %180, %181 : vector<8x128xi1>, vector<8x128xf32>
      %183 = arith.maximumf %131, %182 : vector<8x128xf32>
      %184 = arith.mulf %48, %159 : vector<8x1xf32>
      %cst_47 = arith.constant 0.000000e+00 : f32
      %185 = vector.shape_cast %184 : vector<8x1xf32> to vector<8x1xf32>
      %186 = vector.broadcast %185 : vector<8x1xf32> to vector<8x128xf32>
      %187 = vector.broadcast %cst_47 : f32 to vector<8x128xf32>
      %188 = arith.select %158, %186, %187 : vector<8x128xi1>, vector<8x128xf32>
      %189 = arith.maximumf %137, %188 : vector<8x128xf32>
      %190 = arith.mulf %49, %159 : vector<8x1xf32>
      %cst_48 = arith.constant 0.000000e+00 : f32
      %191 = vector.shape_cast %190 : vector<8x1xf32> to vector<8x1xf32>
      %192 = vector.broadcast %191 : vector<8x1xf32> to vector<8x128xf32>
      %193 = vector.broadcast %cst_48 : f32 to vector<8x128xf32>
      %194 = arith.select %158, %192, %193 : vector<8x128xi1>, vector<8x128xf32>
      %195 = arith.maximumf %143, %194 : vector<8x128xf32>
      %196 = arith.mulf %50, %159 : vector<8x1xf32>
      %cst_49 = arith.constant 0.000000e+00 : f32
      %197 = vector.shape_cast %196 : vector<8x1xf32> to vector<8x1xf32>
      %198 = vector.broadcast %197 : vector<8x1xf32> to vector<8x128xf32>
      %199 = vector.broadcast %cst_49 : f32 to vector<8x128xf32>
      %200 = arith.select %158, %198, %199 : vector<8x128xi1>, vector<8x128xf32>
      %201 = arith.maximumf %149, %200 : vector<8x128xf32>
      %202 = arith.mulf %51, %159 : vector<8x1xf32>
      %cst_50 = arith.constant 0.000000e+00 : f32
      %203 = vector.shape_cast %202 : vector<8x1xf32> to vector<8x1xf32>
      %204 = vector.broadcast %203 : vector<8x1xf32> to vector<8x128xf32>
      %205 = vector.broadcast %cst_50 : f32 to vector<8x128xf32>
      %206 = arith.select %158, %204, %205 : vector<8x128xi1>, vector<8x128xf32>
      %207 = arith.maximumf %155, %206 : vector<8x128xf32>
      %208 = vector.extract_strided_slice %37 {offsets = [0, 3], sizes = [8, 1], strides = [1, 1]} : vector<8x8xi32> to vector<8x1xi32>
      %209 = vector.broadcast %208 : vector<8x1xi32> to vector<8x128xi32>
      %210 = arith.cmpi eq, %209, %6 : vector<8x128xi32>
      %211 = vector.extract_strided_slice %40 {offsets = [0, 3], sizes = [8, 1], strides = [1, 1]} : vector<8x8xf32> to vector<8x1xf32>
      %212 = arith.mulf %44, %211 : vector<8x1xf32>
      %cst_51 = arith.constant 0.000000e+00 : f32
      %213 = vector.shape_cast %212 : vector<8x1xf32> to vector<8x1xf32>
      %214 = vector.broadcast %213 : vector<8x1xf32> to vector<8x128xf32>
      %215 = vector.broadcast %cst_51 : f32 to vector<8x128xf32>
      %216 = arith.select %210, %214, %215 : vector<8x128xi1>, vector<8x128xf32>
      %217 = arith.maximumf %165, %216 : vector<8x128xf32>
      %218 = arith.mulf %45, %211 : vector<8x1xf32>
      %cst_52 = arith.constant 0.000000e+00 : f32
      %219 = vector.shape_cast %218 : vector<8x1xf32> to vector<8x1xf32>
      %220 = vector.broadcast %219 : vector<8x1xf32> to vector<8x128xf32>
      %221 = vector.broadcast %cst_52 : f32 to vector<8x128xf32>
      %222 = arith.select %210, %220, %221 : vector<8x128xi1>, vector<8x128xf32>
      %223 = arith.maximumf %171, %222 : vector<8x128xf32>
      %224 = arith.mulf %46, %211 : vector<8x1xf32>
      %cst_53 = arith.constant 0.000000e+00 : f32
      %225 = vector.shape_cast %224 : vector<8x1xf32> to vector<8x1xf32>
      %226 = vector.broadcast %225 : vector<8x1xf32> to vector<8x128xf32>
      %227 = vector.broadcast %cst_53 : f32 to vector<8x128xf32>
      %228 = arith.select %210, %226, %227 : vector<8x128xi1>, vector<8x128xf32>
      %229 = arith.maximumf %177, %228 : vector<8x128xf32>
      %230 = arith.mulf %47, %211 : vector<8x1xf32>
      %cst_54 = arith.constant 0.000000e+00 : f32
      %231 = vector.shape_cast %230 : vector<8x1xf32> to vector<8x1xf32>
      %232 = vector.broadcast %231 : vector<8x1xf32> to vector<8x128xf32>
      %233 = vector.broadcast %cst_54 : f32 to vector<8x128xf32>
      %234 = arith.select %210, %232, %233 : vector<8x128xi1>, vector<8x128xf32>
      %235 = arith.maximumf %183, %234 : vector<8x128xf32>
      %236 = arith.mulf %48, %211 : vector<8x1xf32>
      %cst_55 = arith.constant 0.000000e+00 : f32
      %237 = vector.shape_cast %236 : vector<8x1xf32> to vector<8x1xf32>
      %238 = vector.broadcast %237 : vector<8x1xf32> to vector<8x128xf32>
      %239 = vector.broadcast %cst_55 : f32 to vector<8x128xf32>
      %240 = arith.select %210, %238, %239 : vector<8x128xi1>, vector<8x128xf32>
      %241 = arith.maximumf %189, %240 : vector<8x128xf32>
      %242 = arith.mulf %49, %211 : vector<8x1xf32>
      %cst_56 = arith.constant 0.000000e+00 : f32
      %243 = vector.shape_cast %242 : vector<8x1xf32> to vector<8x1xf32>
      %244 = vector.broadcast %243 : vector<8x1xf32> to vector<8x128xf32>
      %245 = vector.broadcast %cst_56 : f32 to vector<8x128xf32>
      %246 = arith.select %210, %244, %245 : vector<8x128xi1>, vector<8x128xf32>
      %247 = arith.maximumf %195, %246 : vector<8x128xf32>
      %248 = arith.mulf %50, %211 : vector<8x1xf32>
      %cst_57 = arith.constant 0.000000e+00 : f32
      %249 = vector.shape_cast %248 : vector<8x1xf32> to vector<8x1xf32>
      %250 = vector.broadcast %249 : vector<8x1xf32> to vector<8x128xf32>
      %251 = vector.broadcast %cst_57 : f32 to vector<8x128xf32>
      %252 = arith.select %210, %250, %251 : vector<8x128xi1>, vector<8x128xf32>
      %253 = arith.maximumf %201, %252 : vector<8x128xf32>
      %254 = arith.mulf %51, %211 : vector<8x1xf32>
      %cst_58 = arith.constant 0.000000e+00 : f32
      %255 = vector.shape_cast %254 : vector<8x1xf32> to vector<8x1xf32>
      %256 = vector.broadcast %255 : vector<8x1xf32> to vector<8x128xf32>
      %257 = vector.broadcast %cst_58 : f32 to vector<8x128xf32>
      %258 = arith.select %210, %256, %257 : vector<8x128xi1>, vector<8x128xf32>
      %259 = arith.maximumf %207, %258 : vector<8x128xf32>
      %260 = vector.extract_strided_slice %37 {offsets = [0, 4], sizes = [8, 1], strides = [1, 1]} : vector<8x8xi32> to vector<8x1xi32>
      %261 = vector.broadcast %260 : vector<8x1xi32> to vector<8x128xi32>
      %262 = arith.cmpi eq, %261, %6 : vector<8x128xi32>
      %263 = vector.extract_strided_slice %40 {offsets = [0, 4], sizes = [8, 1], strides = [1, 1]} : vector<8x8xf32> to vector<8x1xf32>
      %264 = arith.mulf %44, %263 : vector<8x1xf32>
      %cst_59 = arith.constant 0.000000e+00 : f32
      %265 = vector.shape_cast %264 : vector<8x1xf32> to vector<8x1xf32>
      %266 = vector.broadcast %265 : vector<8x1xf32> to vector<8x128xf32>
      %267 = vector.broadcast %cst_59 : f32 to vector<8x128xf32>
      %268 = arith.select %262, %266, %267 : vector<8x128xi1>, vector<8x128xf32>
      %269 = arith.maximumf %217, %268 : vector<8x128xf32>
      %270 = arith.mulf %45, %263 : vector<8x1xf32>
      %cst_60 = arith.constant 0.000000e+00 : f32
      %271 = vector.shape_cast %270 : vector<8x1xf32> to vector<8x1xf32>
      %272 = vector.broadcast %271 : vector<8x1xf32> to vector<8x128xf32>
      %273 = vector.broadcast %cst_60 : f32 to vector<8x128xf32>
      %274 = arith.select %262, %272, %273 : vector<8x128xi1>, vector<8x128xf32>
      %275 = arith.maximumf %223, %274 : vector<8x128xf32>
      %276 = arith.mulf %46, %263 : vector<8x1xf32>
      %cst_61 = arith.constant 0.000000e+00 : f32
      %277 = vector.shape_cast %276 : vector<8x1xf32> to vector<8x1xf32>
      %278 = vector.broadcast %277 : vector<8x1xf32> to vector<8x128xf32>
      %279 = vector.broadcast %cst_61 : f32 to vector<8x128xf32>
      %280 = arith.select %262, %278, %279 : vector<8x128xi1>, vector<8x128xf32>
      %281 = arith.maximumf %229, %280 : vector<8x128xf32>
      %282 = arith.mulf %47, %263 : vector<8x1xf32>
      %cst_62 = arith.constant 0.000000e+00 : f32
      %283 = vector.shape_cast %282 : vector<8x1xf32> to vector<8x1xf32>
      %284 = vector.broadcast %283 : vector<8x1xf32> to vector<8x128xf32>
      %285 = vector.broadcast %cst_62 : f32 to vector<8x128xf32>
      %286 = arith.select %262, %284, %285 : vector<8x128xi1>, vector<8x128xf32>
      %287 = arith.maximumf %235, %286 : vector<8x128xf32>
      %288 = arith.mulf %48, %263 : vector<8x1xf32>
      %cst_63 = arith.constant 0.000000e+00 : f32
      %289 = vector.shape_cast %288 : vector<8x1xf32> to vector<8x1xf32>
      %290 = vector.broadcast %289 : vector<8x1xf32> to vector<8x128xf32>
      %291 = vector.broadcast %cst_63 : f32 to vector<8x128xf32>
      %292 = arith.select %262, %290, %291 : vector<8x128xi1>, vector<8x128xf32>
      %293 = arith.maximumf %241, %292 : vector<8x128xf32>
      %294 = arith.mulf %49, %263 : vector<8x1xf32>
      %cst_64 = arith.constant 0.000000e+00 : f32
      %295 = vector.shape_cast %294 : vector<8x1xf32> to vector<8x1xf32>
      %296 = vector.broadcast %295 : vector<8x1xf32> to vector<8x128xf32>
      %297 = vector.broadcast %cst_64 : f32 to vector<8x128xf32>
      %298 = arith.select %262, %296, %297 : vector<8x128xi1>, vector<8x128xf32>
      %299 = arith.maximumf %247, %298 : vector<8x128xf32>
      %300 = arith.mulf %50, %263 : vector<8x1xf32>
      %cst_65 = arith.constant 0.000000e+00 : f32
      %301 = vector.shape_cast %300 : vector<8x1xf32> to vector<8x1xf32>
      %302 = vector.broadcast %301 : vector<8x1xf32> to vector<8x128xf32>
      %303 = vector.broadcast %cst_65 : f32 to vector<8x128xf32>
      %304 = arith.select %262, %302, %303 : vector<8x128xi1>, vector<8x128xf32>
      %305 = arith.maximumf %253, %304 : vector<8x128xf32>
      %306 = arith.mulf %51, %263 : vector<8x1xf32>
      %cst_66 = arith.constant 0.000000e+00 : f32
      %307 = vector.shape_cast %306 : vector<8x1xf32> to vector<8x1xf32>
      %308 = vector.broadcast %307 : vector<8x1xf32> to vector<8x128xf32>
      %309 = vector.broadcast %cst_66 : f32 to vector<8x128xf32>
      %310 = arith.select %262, %308, %309 : vector<8x128xi1>, vector<8x128xf32>
      %311 = arith.maximumf %259, %310 : vector<8x128xf32>
      %312 = vector.extract_strided_slice %37 {offsets = [0, 5], sizes = [8, 1], strides = [1, 1]} : vector<8x8xi32> to vector<8x1xi32>
      %313 = vector.broadcast %312 : vector<8x1xi32> to vector<8x128xi32>
      %314 = arith.cmpi eq, %313, %6 : vector<8x128xi32>
      %315 = vector.extract_strided_slice %40 {offsets = [0, 5], sizes = [8, 1], strides = [1, 1]} : vector<8x8xf32> to vector<8x1xf32>
      %316 = arith.mulf %44, %315 : vector<8x1xf32>
      %cst_67 = arith.constant 0.000000e+00 : f32
      %317 = vector.shape_cast %316 : vector<8x1xf32> to vector<8x1xf32>
      %318 = vector.broadcast %317 : vector<8x1xf32> to vector<8x128xf32>
      %319 = vector.broadcast %cst_67 : f32 to vector<8x128xf32>
      %320 = arith.select %314, %318, %319 : vector<8x128xi1>, vector<8x128xf32>
      %321 = arith.maximumf %269, %320 : vector<8x128xf32>
      %322 = arith.mulf %45, %315 : vector<8x1xf32>
      %cst_68 = arith.constant 0.000000e+00 : f32
      %323 = vector.shape_cast %322 : vector<8x1xf32> to vector<8x1xf32>
      %324 = vector.broadcast %323 : vector<8x1xf32> to vector<8x128xf32>
      %325 = vector.broadcast %cst_68 : f32 to vector<8x128xf32>
      %326 = arith.select %314, %324, %325 : vector<8x128xi1>, vector<8x128xf32>
      %327 = arith.maximumf %275, %326 : vector<8x128xf32>
      %328 = arith.mulf %46, %315 : vector<8x1xf32>
      %cst_69 = arith.constant 0.000000e+00 : f32
      %329 = vector.shape_cast %328 : vector<8x1xf32> to vector<8x1xf32>
      %330 = vector.broadcast %329 : vector<8x1xf32> to vector<8x128xf32>
      %331 = vector.broadcast %cst_69 : f32 to vector<8x128xf32>
      %332 = arith.select %314, %330, %331 : vector<8x128xi1>, vector<8x128xf32>
      %333 = arith.maximumf %281, %332 : vector<8x128xf32>
      %334 = arith.mulf %47, %315 : vector<8x1xf32>
      %cst_70 = arith.constant 0.000000e+00 : f32
      %335 = vector.shape_cast %334 : vector<8x1xf32> to vector<8x1xf32>
      %336 = vector.broadcast %335 : vector<8x1xf32> to vector<8x128xf32>
      %337 = vector.broadcast %cst_70 : f32 to vector<8x128xf32>
      %338 = arith.select %314, %336, %337 : vector<8x128xi1>, vector<8x128xf32>
      %339 = arith.maximumf %287, %338 : vector<8x128xf32>
      %340 = arith.mulf %48, %315 : vector<8x1xf32>
      %cst_71 = arith.constant 0.000000e+00 : f32
      %341 = vector.shape_cast %340 : vector<8x1xf32> to vector<8x1xf32>
      %342 = vector.broadcast %341 : vector<8x1xf32> to vector<8x128xf32>
      %343 = vector.broadcast %cst_71 : f32 to vector<8x128xf32>
      %344 = arith.select %314, %342, %343 : vector<8x128xi1>, vector<8x128xf32>
      %345 = arith.maximumf %293, %344 : vector<8x128xf32>
      %346 = arith.mulf %49, %315 : vector<8x1xf32>
      %cst_72 = arith.constant 0.000000e+00 : f32
      %347 = vector.shape_cast %346 : vector<8x1xf32> to vector<8x1xf32>
      %348 = vector.broadcast %347 : vector<8x1xf32> to vector<8x128xf32>
      %349 = vector.broadcast %cst_72 : f32 to vector<8x128xf32>
      %350 = arith.select %314, %348, %349 : vector<8x128xi1>, vector<8x128xf32>
      %351 = arith.maximumf %299, %350 : vector<8x128xf32>
      %352 = arith.mulf %50, %315 : vector<8x1xf32>
      %cst_73 = arith.constant 0.000000e+00 : f32
      %353 = vector.shape_cast %352 : vector<8x1xf32> to vector<8x1xf32>
      %354 = vector.broadcast %353 : vector<8x1xf32> to vector<8x128xf32>
      %355 = vector.broadcast %cst_73 : f32 to vector<8x128xf32>
      %356 = arith.select %314, %354, %355 : vector<8x128xi1>, vector<8x128xf32>
      %357 = arith.maximumf %305, %356 : vector<8x128xf32>
      %358 = arith.mulf %51, %315 : vector<8x1xf32>
      %cst_74 = arith.constant 0.000000e+00 : f32
      %359 = vector.shape_cast %358 : vector<8x1xf32> to vector<8x1xf32>
      %360 = vector.broadcast %359 : vector<8x1xf32> to vector<8x128xf32>
      %361 = vector.broadcast %cst_74 : f32 to vector<8x128xf32>
      %362 = arith.select %314, %360, %361 : vector<8x128xi1>, vector<8x128xf32>
      %363 = arith.maximumf %311, %362 : vector<8x128xf32>
      %364 = vector.extract_strided_slice %37 {offsets = [0, 6], sizes = [8, 1], strides = [1, 1]} : vector<8x8xi32> to vector<8x1xi32>
      %365 = vector.broadcast %364 : vector<8x1xi32> to vector<8x128xi32>
      %366 = arith.cmpi eq, %365, %6 : vector<8x128xi32>
      %367 = vector.extract_strided_slice %40 {offsets = [0, 6], sizes = [8, 1], strides = [1, 1]} : vector<8x8xf32> to vector<8x1xf32>
      %368 = arith.mulf %44, %367 : vector<8x1xf32>
      %cst_75 = arith.constant 0.000000e+00 : f32
      %369 = vector.shape_cast %368 : vector<8x1xf32> to vector<8x1xf32>
      %370 = vector.broadcast %369 : vector<8x1xf32> to vector<8x128xf32>
      %371 = vector.broadcast %cst_75 : f32 to vector<8x128xf32>
      %372 = arith.select %366, %370, %371 : vector<8x128xi1>, vector<8x128xf32>
      %373 = arith.maximumf %321, %372 : vector<8x128xf32>
      %374 = arith.mulf %45, %367 : vector<8x1xf32>
      %cst_76 = arith.constant 0.000000e+00 : f32
      %375 = vector.shape_cast %374 : vector<8x1xf32> to vector<8x1xf32>
      %376 = vector.broadcast %375 : vector<8x1xf32> to vector<8x128xf32>
      %377 = vector.broadcast %cst_76 : f32 to vector<8x128xf32>
      %378 = arith.select %366, %376, %377 : vector<8x128xi1>, vector<8x128xf32>
      %379 = arith.maximumf %327, %378 : vector<8x128xf32>
      %380 = arith.mulf %46, %367 : vector<8x1xf32>
      %cst_77 = arith.constant 0.000000e+00 : f32
      %381 = vector.shape_cast %380 : vector<8x1xf32> to vector<8x1xf32>
      %382 = vector.broadcast %381 : vector<8x1xf32> to vector<8x128xf32>
      %383 = vector.broadcast %cst_77 : f32 to vector<8x128xf32>
      %384 = arith.select %366, %382, %383 : vector<8x128xi1>, vector<8x128xf32>
      %385 = arith.maximumf %333, %384 : vector<8x128xf32>
      %386 = arith.mulf %47, %367 : vector<8x1xf32>
      %cst_78 = arith.constant 0.000000e+00 : f32
      %387 = vector.shape_cast %386 : vector<8x1xf32> to vector<8x1xf32>
      %388 = vector.broadcast %387 : vector<8x1xf32> to vector<8x128xf32>
      %389 = vector.broadcast %cst_78 : f32 to vector<8x128xf32>
      %390 = arith.select %366, %388, %389 : vector<8x128xi1>, vector<8x128xf32>
      %391 = arith.maximumf %339, %390 : vector<8x128xf32>
      %392 = arith.mulf %48, %367 : vector<8x1xf32>
      %cst_79 = arith.constant 0.000000e+00 : f32
      %393 = vector.shape_cast %392 : vector<8x1xf32> to vector<8x1xf32>
      %394 = vector.broadcast %393 : vector<8x1xf32> to vector<8x128xf32>
      %395 = vector.broadcast %cst_79 : f32 to vector<8x128xf32>
      %396 = arith.select %366, %394, %395 : vector<8x128xi1>, vector<8x128xf32>
      %397 = arith.maximumf %345, %396 : vector<8x128xf32>
      %398 = arith.mulf %49, %367 : vector<8x1xf32>
      %cst_80 = arith.constant 0.000000e+00 : f32
      %399 = vector.shape_cast %398 : vector<8x1xf32> to vector<8x1xf32>
      %400 = vector.broadcast %399 : vector<8x1xf32> to vector<8x128xf32>
      %401 = vector.broadcast %cst_80 : f32 to vector<8x128xf32>
      %402 = arith.select %366, %400, %401 : vector<8x128xi1>, vector<8x128xf32>
      %403 = arith.maximumf %351, %402 : vector<8x128xf32>
      %404 = arith.mulf %50, %367 : vector<8x1xf32>
      %cst_81 = arith.constant 0.000000e+00 : f32
      %405 = vector.shape_cast %404 : vector<8x1xf32> to vector<8x1xf32>
      %406 = vector.broadcast %405 : vector<8x1xf32> to vector<8x128xf32>
      %407 = vector.broadcast %cst_81 : f32 to vector<8x128xf32>
      %408 = arith.select %366, %406, %407 : vector<8x128xi1>, vector<8x128xf32>
      %409 = arith.maximumf %357, %408 : vector<8x128xf32>
      %410 = arith.mulf %51, %367 : vector<8x1xf32>
      %cst_82 = arith.constant 0.000000e+00 : f32
      %411 = vector.shape_cast %410 : vector<8x1xf32> to vector<8x1xf32>
      %412 = vector.broadcast %411 : vector<8x1xf32> to vector<8x128xf32>
      %413 = vector.broadcast %cst_82 : f32 to vector<8x128xf32>
      %414 = arith.select %366, %412, %413 : vector<8x128xi1>, vector<8x128xf32>
      %415 = arith.maximumf %363, %414 : vector<8x128xf32>
      %416 = vector.extract_strided_slice %37 {offsets = [0, 7], sizes = [8, 1], strides = [1, 1]} : vector<8x8xi32> to vector<8x1xi32>
      %417 = vector.broadcast %416 : vector<8x1xi32> to vector<8x128xi32>
      %418 = arith.cmpi eq, %417, %6 : vector<8x128xi32>
      %419 = vector.extract_strided_slice %40 {offsets = [0, 7], sizes = [8, 1], strides = [1, 1]} : vector<8x8xf32> to vector<8x1xf32>
      %420 = arith.mulf %44, %419 : vector<8x1xf32>
      %cst_83 = arith.constant 0.000000e+00 : f32
      %421 = vector.shape_cast %420 : vector<8x1xf32> to vector<8x1xf32>
      %422 = vector.broadcast %421 : vector<8x1xf32> to vector<8x128xf32>
      %423 = vector.broadcast %cst_83 : f32 to vector<8x128xf32>
      %424 = arith.select %418, %422, %423 : vector<8x128xi1>, vector<8x128xf32>
      %425 = arith.maximumf %373, %424 : vector<8x128xf32>
      %426 = arith.mulf %45, %419 : vector<8x1xf32>
      %cst_84 = arith.constant 0.000000e+00 : f32
      %427 = vector.shape_cast %426 : vector<8x1xf32> to vector<8x1xf32>
      %428 = vector.broadcast %427 : vector<8x1xf32> to vector<8x128xf32>
      %429 = vector.broadcast %cst_84 : f32 to vector<8x128xf32>
      %430 = arith.select %418, %428, %429 : vector<8x128xi1>, vector<8x128xf32>
      %431 = arith.maximumf %379, %430 : vector<8x128xf32>
      %432 = arith.mulf %46, %419 : vector<8x1xf32>
      %cst_85 = arith.constant 0.000000e+00 : f32
      %433 = vector.shape_cast %432 : vector<8x1xf32> to vector<8x1xf32>
      %434 = vector.broadcast %433 : vector<8x1xf32> to vector<8x128xf32>
      %435 = vector.broadcast %cst_85 : f32 to vector<8x128xf32>
      %436 = arith.select %418, %434, %435 : vector<8x128xi1>, vector<8x128xf32>
      %437 = arith.maximumf %385, %436 : vector<8x128xf32>
      %438 = arith.mulf %47, %419 : vector<8x1xf32>
      %cst_86 = arith.constant 0.000000e+00 : f32
      %439 = vector.shape_cast %438 : vector<8x1xf32> to vector<8x1xf32>
      %440 = vector.broadcast %439 : vector<8x1xf32> to vector<8x128xf32>
      %441 = vector.broadcast %cst_86 : f32 to vector<8x128xf32>
      %442 = arith.select %418, %440, %441 : vector<8x128xi1>, vector<8x128xf32>
      %443 = arith.maximumf %391, %442 : vector<8x128xf32>
      %444 = arith.mulf %48, %419 : vector<8x1xf32>
      %cst_87 = arith.constant 0.000000e+00 : f32
      %445 = vector.shape_cast %444 : vector<8x1xf32> to vector<8x1xf32>
      %446 = vector.broadcast %445 : vector<8x1xf32> to vector<8x128xf32>
      %447 = vector.broadcast %cst_87 : f32 to vector<8x128xf32>
      %448 = arith.select %418, %446, %447 : vector<8x128xi1>, vector<8x128xf32>
      %449 = arith.maximumf %397, %448 : vector<8x128xf32>
      %450 = arith.mulf %49, %419 : vector<8x1xf32>
      %cst_88 = arith.constant 0.000000e+00 : f32
      %451 = vector.shape_cast %450 : vector<8x1xf32> to vector<8x1xf32>
      %452 = vector.broadcast %451 : vector<8x1xf32> to vector<8x128xf32>
      %453 = vector.broadcast %cst_88 : f32 to vector<8x128xf32>
      %454 = arith.select %418, %452, %453 : vector<8x128xi1>, vector<8x128xf32>
      %455 = arith.maximumf %403, %454 : vector<8x128xf32>
      %456 = arith.mulf %50, %419 : vector<8x1xf32>
      %cst_89 = arith.constant 0.000000e+00 : f32
      %457 = vector.shape_cast %456 : vector<8x1xf32> to vector<8x1xf32>
      %458 = vector.broadcast %457 : vector<8x1xf32> to vector<8x128xf32>
      %459 = vector.broadcast %cst_89 : f32 to vector<8x128xf32>
      %460 = arith.select %418, %458, %459 : vector<8x128xi1>, vector<8x128xf32>
      %461 = arith.maximumf %409, %460 : vector<8x128xf32>
      %462 = arith.mulf %51, %419 : vector<8x1xf32>
      %cst_90 = arith.constant 0.000000e+00 : f32
      %463 = vector.shape_cast %462 : vector<8x1xf32> to vector<8x1xf32>
      %464 = vector.broadcast %463 : vector<8x1xf32> to vector<8x128xf32>
      %465 = vector.broadcast %cst_90 : f32 to vector<8x128xf32>
      %466 = arith.select %418, %464, %465 : vector<8x128xi1>, vector<8x128xf32>
      %467 = arith.maximumf %415, %466 : vector<8x128xf32>
      scf.yield %425, %431, %437, %443, %449, %455, %461, %467 : vector<8x128xf32>, vector<8x128xf32>, vector<8x128xf32>, vector<8x128xf32>, vector<8x128xf32>, vector<8x128xf32>, vector<8x128xf32>, vector<8x128xf32>
    }
    %c2_i32_9 = arith.constant 2 : i32
    %17 = vector.shape_cast %16#0 : vector<8x128xf32> to vector<1x8x128xf32>
    %18 = vector.shape_cast %16#1 : vector<8x128xf32> to vector<1x8x128xf32>
    %19 = vector.shape_cast %16#2 : vector<8x128xf32> to vector<1x8x128xf32>
    %20 = vector.shape_cast %16#3 : vector<8x128xf32> to vector<1x8x128xf32>
    %21 = vector.shape_cast %16#4 : vector<8x128xf32> to vector<1x8x128xf32>
    %22 = vector.shape_cast %16#5 : vector<8x128xf32> to vector<1x8x128xf32>
    %23 = vector.shape_cast %16#6 : vector<8x128xf32> to vector<1x8x128xf32>
    %24 = vector.shape_cast %16#7 : vector<8x128xf32> to vector<1x8x128xf32>
    %25 = tpu.concatenate %17, %18, %19, %20, %21, %22, %23, %24 in 0 : vector<1x8x128xf32>, vector<1x8x128xf32>, vector<1x8x128xf32>, vector<1x8x128xf32>, vector<1x8x128xf32>, vector<1x8x128xf32>, vector<1x8x128xf32>, vector<1x8x128xf32> -> vector<8x8x128xf32>
    %cst_10 = arith.constant dense<0xFF800000> : vector<8x128xf32>
    %26 = vector.multi_reduction <maximumf>, %25, %cst_10 [1] : vector<8x8x128xf32> to vector<8x128xf32>
    %c0 = arith.constant 0 : index
    %c0_11 = arith.constant 0 : index
    %c0_12 = arith.constant 0 : index
    %c0_13 = arith.constant 0 : index
    %27 = vector.load %arg7[%c0, %c0_11, %c0_12, %c0_13] : memref<1x1x8x128xf32, #tpu.memory_space<vmem>>, vector<1x1x8x128xf32>
    %28 = vector.shape_cast %27 : vector<1x1x8x128xf32> to vector<8x128xf32>
    %29 = arith.maximumf %28, %26 : vector<8x128xf32>
    %c0_14 = arith.constant 0 : index
    %c0_15 = arith.constant 0 : index
    %c0_16 = arith.constant 0 : index
    %c0_17 = arith.constant 0 : index
    %30 = vector.load %arg7[%c0_14, %c0_15, %c0_16, %c0_17] : memref<1x1x8x128xf32, #tpu.memory_space<vmem>>, vector<1x1x8x128xf32>
    %31 = vector.shape_cast %30 : vector<1x1x8x128xf32> to vector<8x128xf32>
    %32 = vector.shape_cast %29 : vector<8x128xf32> to vector<1x1x8x128xf32>
    tpu.vector_store %arg7[%c0_14, %c0_15, %c0_16, %c0_17], %32 {strides = array<i32>} : memref<1x1x8x128xf32, #tpu.memory_space<vmem>>, vector<1x1x8x128xf32>,
    return
  }
  func.func @transform_0(%arg0: i32, %arg1: i32, %arg2: i32, %arg3: i32) -> (i32, i32, i32, i32) {
    %c0_i32 = arith.constant 0 : i32
    %c0_i32_0 = arith.constant 0 : i32
    return %arg0, %arg1, %arg3, %c0_i32 : i32, i32, i32, i32
  }
  func.func @transform_1(%arg0: i32, %arg1: i32, %arg2: i32, %arg3: i32) -> (i32, i32, i32, i32) {
    %c0_i32 = arith.constant 0 : i32
    %c0_i32_0 = arith.constant 0 : i32
    return %arg0, %arg1, %arg3, %c0_i32 : i32, i32, i32, i32
  }
  func.func @transform_2(%arg0: i32, %arg1: i32, %arg2: i32, %arg3: i32) -> (i32, i32, i32, i32) {
    %c0_i32 = arith.constant 0 : i32
    %c0_i32_0 = arith.constant 0 : i32
    return %arg0, %arg1, %arg3, %c0_i32 : i32, i32, i32, i32
  }
  func.func @transform_3(%arg0: i32, %arg1: i32, %arg2: i32, %arg3: i32) -> (i32, i32, i32, i32) {
    %c0_i32 = arith.constant 0 : i32
    %c0_i32_0 = arith.constant 0 : i32
    return %arg0, %arg1, %c0_i32, %arg2 : i32, i32, i32, i32
  }
}

</mosaic_0001>

<bundles_post_ra>
// kernel: tpu_custom_call.1
= control target key start
LH: loop header
LB: loop body
LE: loop exit
PB: predicated region body
PF: predicated region fallthrough
CT: control target
= control target key end

     0   :  { %8 = vsyncpa [#allocation3], 0  ;;  %s2204_s0 = inlined_call_operand.vmem [shape: s32[2,4,16,8], index: 0, kind: input, shape index: {}]   ;;  %s2205_s1 = inlined_call_operand.vmem [shape: f32[2,4,16,8], index: 1, kind: input, shape index: {}]   ;;  %s2206_s2 = inlined_call_operand.vmem [shape: f32[2,4,16,8], index: 2, kind: input, shape index: {}]   ;;  %s2207_s3 = inlined_call_operand.hbm [shape: f32[2,4,8,128], index: 3, kind: output, shape index: {}]  }
   0x1   :  { %10 = vsyncpa [#allocation3 + $0x1], 0  ;;  %s1571_s12 = smov 0   ;;  %s1573_s13 = smov 0  }
   0x2   :  { %s1575_s14 = smov 0   ;;  %s1577_s15 = smov 0  }
   0x3   :  { %s1579_s16 = smov 0   ;;  %s1581_s17 = smov 0  }
   0x4   :  { %s1583_s18 = smov 0   ;;  %s1585_s19 = smov 0  }
   0x5 LB: > { %2213 = sst [smem:[#allocation5_spill]] %s1482_s17  ;;  %s1116_s20 = sadd.s32 4294967295, %s1490_s19   ;;  %s1490_s19 = sphi %s1585_s19, %s16_s19   ;;  %s1486_s18 = sphi %s1583_s18, %s2248_s18   ;;  %s1482_s17 = sphi %s1581_s17, %s2247_s17   ;;  %s1478_s16 = sphi %s1579_s16, %s2246_s16   ;;  %s1474_s15 = sphi %s1577_s15, %s2245_s15   ;;  %s1470_s14 = sphi %s1575_s14, %s2251_s14   ;;  %s1466_s13 = sphi %s1573_s13, %s2250_s13   ;;  %s1462_s12 = sphi %s1571_s12, %s2249_s12  }
   0x6   : > { %2214 = sst [smem:[#allocation6_spill]] %s1486_s18  ;;  %s1117_s21 = sadd.s32 4294967294, %s1490_s19  }
   0x7   : > { %s38_s22 = sadd.s32 1, %s1482_s17  ;;  %s42_s23 = sadd.s32 1, %s1486_s18 }
   0x8   : > { %p40_p0 = scmp.ge.s32.totalorder %s38_s22, 4  ;;  %p153_p1 = scmp.ne.s32.totalorder %s1470_s14, %s1466_s13 }
   0x9   : > { %p154_p2 = scmp.eq.s32.totalorder %s1116_s20, 7  ;;  %p159_p5 = scmp.ne.s32.totalorder %s1466_s13, %s1462_s12 }
   0xa   : > { %s2253_s22 = smov (%p40_p0, %s38_s22), 0  ;;  %s2255_s23 = smov (!%p40_p0, %s42_s23), %s1486_s18 }
   0xb   : > { %2215 = sst [smem:[#allocation7_spill]] %s2253_s22  ;;  %s137_s24 = ssub.s32 %s1482_s17, %s2253_s22 }
   0xc   : > { %p1622_p3 = por %p154_p2, %p153_p1  ;;  %p44_p4 = scmp.ge.s32.totalorder %s2255_s23, 2 }
   0xd   : > { %p160_p6 = scmp.eq.s32.totalorder %s1117_s21, 7  ;;  %p1120_p7 = scmp.ge.s32.totalorder %s1490_s19, 1 }
   0xe   : > { %s2257_s23 = smov (%p44_p4, %s2255_s23), 0  ;;  %p229_p9 = scmp.lt.s32.totalorder %s1490_s19, 9 }
   0xf   : > { %2217 = sst [smem:[#allocation8_spill]] %s2257_s23  ;;  %p1631_p8 = por %p160_p6, %p159_p5 }
  0x10   : > { %s136_s27 = ssub.s32 %s1486_s18, %s2257_s23  ;;  %s143_s28 = sadd.s32 1, %s1470_s14 }
  0x11   : > { %s138_s29 = sor.u32 %s137_s24, %s136_s27  ;;  %p230_p10 = pnand %p1120_p7, %p229_p9 }
  0x12   : > { %p141_p11 = scmp.eq.s32.totalorder %s138_s29, 0  ;;  %s2208_s4 = sand.u32 (!%p230_p10), 1, %s1466_s13  }
  0x13   : > { %233 = sbr.rel (%p230_p10) target bundleno = 653 (0x28d), region = 32  ;;  %p288_p12 = scmp.lt.s32.totalorder (!%p230_p10), %s1478_s16, 1 }
  0x14   : > { %s1640_s30 = scalar_select %p141_p11, %s1470_s14, %s143_s28  }
  0x15   : > { %s1121_s5 = sshll.u32 (!%p230_p10), %s2208_s4, 3  ;;  %p290_p13 = scmp.lt.s32.totalorder (!%p230_p10), %s1474_s15, 3 }
  0x16   : > { %s1650_s7 = scalar_lea.vmem (!%p230_p10), [#allocation2], %s1121_s5 }
  0x18   : > { %v334_v0 = vlaneseq  ;;  %s289_s6 = scalar_select %p288_p12, %s1478_s16, 1  ;;  %v1528_v2 = vmov 0.0   ;;  %v1668_v3 = vmov 0.0   ;;  %v1670_v4 = vmov 0.0  }
  0x19   : > { %333 = vst [vmem:[%s1650_s7] sm:$0xff] %v1528_v2  ;;  %s291_s8 = scalar_select %p290_p13, %s1474_s15, 3  ;;  %v1672_v5 = vmov 0.0   ;;  %v1674_v6 = vmov 0.0   ;;  %v1676_v7 = vmov 0.0   ;;  %v1678_v8 = vmov 0.0  }
  0x1a   : > { %v1647_v1 = vand.u32 127, %v334_v0  ;;  %s1123_s9 = sshll.u32 %s289_s6, 3  ;;  %v1680_v9 = vmov 0.0   ;;  %v1682_v10 = vmov 0.0   ;;  %s1684_s6 = smov 0  }
  0x1b   : > { %s1122_s10 = sshll.u32 %s291_s8, 1 }
  0x1c   : > { %s297_s11 = sadd.s32 %s1123_s9, %s1122_s10 }
  0x1d   : > { %s1654_s20 = sshll.u32 %s297_s11, 3 }
  0x1e   : > { %s299_s27 = scalar_lea.vmem %s2204_s0, %s1654_s20  ;;  %s313_s5 = scalar_lea.vmem %s2205_s1, %s1654_s20 }
  0x1f   : > { %s327_s22 = scalar_lea.vmem %s2206_s2, %s1654_s20 }
  0x20 LB: >> { %v1529_v11 = vmov 0   ;;  %s1131_s23 = sshll.u32 %s1526_s6, 3  ;;  %s1530_s18 = smov 2   ;;  %v1532_v15 = vmov 1   ;;  %v1535_v17 = vmov 2   ;;  %v1542_v18 = vmov 3   ;;  %s1526_s6 = sphi %s1684_s6, %s344_s6   ;;  %v1522_v10 = vphi %v1682_v10, %v2243_v10   ;;  %v1518_v9 = vphi %v1680_v9, %v2242_v9   ;;  %v1514_v8 = vphi %v1678_v8, %v2241_v8   ;;  %v1510_v7 = vphi %v1676_v7, %v2240_v7   ;;  %v1506_v6 = vphi %v1674_v6, %v2239_v6   ;;  %v1502_v5 = vphi %v1672_v5, %v2238_v5   ;;  %v1498_v4 = vphi %v1670_v4, %v2237_v4   ;;  %v1494_v3 = vphi %v1668_v3, %v2236_v3  }
  0x21   : >> { %1303 = vset.pattern.permute.xlu0 %v1529_v11  ;;  %s356_s9 = scalar_lea.vmem %s313_s5, %s1131_s23  ;;  %s358_s21 = scalar_lea.vmem %s327_s22, %s1131_s23  ;;  %1304 = vset.pattern.permute.xlu2 %v1532_v15  ;;  %v1543_v19 = vmov 4   ;;  %v1544_v24 = vmov 5   ;;  %v1545_v25 = vmov 6   ;;  %v1546_v44 = vmov 7  }
  0x22   : >> { %v1720_v12 = vld [vmem:[%s356_s9] sm:$0xff]  ;;  %s354_s29 = scalar_lea.vmem %s299_s27, %s1131_s23  ;;  %s1531_s17 = smov 1   ;;  %1305 = vset.pattern.permute.xlu1 %v1535_v17 }
  0x23   : >> { %384 = vrot.lane.b32.xlu2 %v1720_v12, %s1530_s18  ;;  %373 = vrot.lane.b32.xlu1 %v1720_v12, %s1531_s17  ;;  %v1734_v13 = vld [vmem:[%s354_s29] sm:$0xff]  ;;  %s1533_s23 = smov 4   ;;  %s1534_s18 = smov 5  }
  0x24   : >> { %361 = vperm.xlu0 %1303, %v1734_v13   ;;  %v1737_v14 = vld [vmem:[%s358_s21] sm:$0xff]  ;;  %s1536_s17 = smov 6   ;;  %s1537_s4 = smov 3  }
  0x25   : >> { %v1742_v16 = vmul.f32 %v1737_v14, %v1720_v12  ;;  %s1538_s8 = smov 7   ;;  %s1539_s9 = smov 126  }
  0x26   : >> { %s1540_s10 = smov 127   ;;  %s1541_s11 = smov 125  }
  0x27   : >> { %s1547_s21 = smov 124   ;;  %s1548_s24 = smov 123  }
  0x28   : >> { %s1549_s28 = smov 122   ;;  %s1550_s29 = smov 121  }
  0x29   : >> { %s344_s6 = sadd.s32 1, %s1526_s6  }
  0x2a   : >> { %p341_p0 = scmp.ge.s32.totalorder %s344_s6, 2  }
  0x2b   : >> { %406 = vrot.lane.b32.xlu2 %v1720_v12, %s1533_s23  ;;  %417 = vrot.lane.b32.xlu1 %v1720_v12, %s1534_s18  ;;  %s1133_s22 = sshll.u32 (%p341_p0), %s1478_s16, 2  ;;  %vm906_vm8 = vcmask (%p341_p0), 1041409   ;;  %vm908_vm9 = vcmask (%p341_p0), 1042434   ;;  %vm910_vm10 = vcmask (%p341_p0), 1043459   ;;  %vm912_vm11 = vcmask (%p341_p0), 1044484   ;;  %s939_s6 = sshll.u32 (%p341_p0), %s1650_s7, 4  ;;  %s940_s6 = int_to_ptr.vmem [resolvable:$true] %s939_s6 }
  0x2c   : >> { %367 = vperm.xlu0 %1303, %v1742_v16   ;;  %s935_s20 = sadd.s32 (%p341_p0), %s1474_s15, %s1133_s22  ;;  %vm914_vm12 = vcmask (%p341_p0), 1045509   ;;  %vm916_vm13 = vcmask (%p341_p0), 1046534   ;;  %vm918_vm14 = vcmask (%p341_p0), 1047559   ;;  %s2244_s18 = sand.u32 (%p341_p0), 1, %s1466_s13  }
  0x2d   : > { %s1134_s16 = sshll.u32 (%p341_p0), %s935_s20, 3 }
  0x2e   : > { %s937_s5 = scalar_lea.hbm (%p341_p0), %s2207_s3, %s1134_s16 }
  0x2f   : > { %s941_s23 = sshll.u32 (%p341_p0), %s937_s5, 4  ;;  %s942_s23 = int_to_ptr.hbm [resolvable:$true] %s941_s23 }
  0x33   : >> { %428 = vrot.lane.b32.xlu1 %v1720_v12, %s1536_s17  ;;  %451 = vperm.xlu2 %1304, %v1734_v13   ;;  %s924_s17 = scalar_lea.sflag (%p341_p0), [#allocation3], %s2244_s18 }
  0x34   : >> { %395 = vrot.lane.b32.xlu0 %v1720_v12, %s1537_s4  ;;  %s1374_s4 = sshra.s32 (%p341_p0), %s942_s23, 4  ;;  %s1375_s4 = int_to_ptr.hbm [resolvable:$true] %s1374_s4 }
  0x35   : >> { %1310 = vset.pattern.permute.xlu0 %v1543_v19  ;;  %p1381_p5 = scmp.lt.s32.totalorder (%p341_p0), %s1375_s4, %s2207_s3 }
  0x3b   : >> { %466 = vperm.xlu2 %1304, %v1742_v16   ;;  %508 = vperm.xlu1 %1305, %v1734_v13  }
  0x3c   : >> { %439 = vrot.lane.b32.xlu0 %v1720_v12, %s1538_s8  ;;  %s1376_s8 = scalar_lea.hbm (%p341_p0), %s1375_s4, 8 }
  0x3d   : > { %p1377_p1 = scmp.ne.s32.totalorder (%p341_p0), %s1375_s4, %s1376_s8 }
  0x3f   : > { %p1378_p2 = pnand (%p341_p0), %p1377_p1, %p1622_p3 }
  0x41   : > { %p1379_p4 = pneg (%p341_p0), %p1378_p2 }
  0x43   : >> { %511 = vrot.lane.b32.xlu2 %v1720_v12, %s1539_s9  ;;  %1306 = vset.pattern.permute.xlu1 %v1542_v18 }
  0x44   : >> { %454 = vrot.lane.b32.xlu0 %v1720_v12, %s1540_s10  ;;  %1308 = vset.pattern.permute.xlu2 %v1535_v17 }
  0x45   : >> { %565 = vperm.xlu1 %1306, %v1734_v13  }
  0x4b   : >> { %568 = vrot.lane.b32.xlu2 %v1720_v12, %s1541_s11  ;;  %s1380_s11 = scalar_lea.hbm (%p341_p0), %s2207_s3, 64 }
  0x4c   : > { %p1382_p6 = scmp.lt.s32.totalorder (%p341_p0), %s1380_s11, %s1376_s8 }
  0x4d   : >> { %592 = vperm.xlu1 %1306, %v1742_v16  }
  0x4e   : > { %p1383_p7 = por (%p341_p0), %p1382_p6, %p1381_p5 }
  0x50   : > { %p1384_p9 = pnand (%p341_p0), %p1383_p7, %p1379_p4 }
  0x55   : >> { %1307 = vset.pattern.permute.xlu1 %v1532_v15 }
  0x7d   : >> { %v385_v20 = vpop.permute.xlu2 %384 }
  0x7e   : >> { %v1762_v21 = vmul.f32 %v385_v20, %v1737_v14 }
  0x80   : >> { %390 = vperm.xlu2 %1308, %v1762_v21  }
  0x85   : >> { %v407_v22 = vpop.permute.xlu2 %406 }
  0x86   : >> { %v1766_v23 = vmul.f32 %v407_v22, %v1737_v14 }
  0x88   : >> { %412 = vperm.xlu0 %1310, %v1766_v23   ;;  %1311 = vset.pattern.permute.xlu2 %v1544_v24 }
  0x8d   : >> { %v452_v29 = vpop.permute.xlu2 %451 }
  0x8e   : >> { %vm1793_vm1 = vcmp.eq.s32.totalorder %v452_v29, %v1647_v1 }
  0x90   : >> { %1349 = vset.pattern.permute.xlu0 %v1545_v25 }
  0x91   : >> { %781 = vperm.xlu0 %1349, %v1742_v16  }
  0x95   : >> { %v374_v26 = vpop.permute.xlu1 %373  ;;  %v1798_v36 = vpop.permute.xlu2 %466 }
  0x96   : >> { %v1773_v27 = vmul.f32 %v374_v26, %v1737_v14  ;;  %v362_v28 = vpop.permute.xlu0 %361  ;;  %v469_v37 = vsel %vm1793_vm1, %v1798_v36, 0.0 }
  0x97   : >> { %vm1778_vm0 = vcmp.eq.s32.totalorder %v362_v28, %v1647_v1 }
  0x98   : >> { %379 = vperm.xlu1 %1307, %v1773_v27  }
  0x99   : >> { %1350 = vset.pattern.permute.xlu0 %v1535_v17 }
  0x9a   : >> { %472 = vperm.xlu0 %1350, %v1773_v27  }
  0x9d   : >> { %v418_v31 = vpop.permute.xlu1 %417  ;;  %v512_v47 = vpop.permute.xlu2 %511 }
  0x9e   : >> { %v1783_v32 = vmul.f32 %v418_v31, %v1737_v14  ;;  %v1785_v33 = vpop.permute.xlu0 %367  ;;  %v1825_v48 = vmul.f32 %v512_v47, %v1737_v14 }
  0x9f   : >> { %v370_v34 = vsel %vm1778_vm0, %v1785_v33, 0.0 }
  0xa0   : >> { %423 = vperm.xlu2 %1311, %v1783_v32   ;;  %1309 = vset.pattern.permute.xlu1 %v1542_v18 }
  0xa2   : >> { %529 = vperm.xlu0 %1350, %v1742_v16  }
  0xa5   : >> { %v429_v38 = vpop.permute.xlu1 %428  ;;  %v569_v49 = vpop.permute.xlu2 %568 }
  0xa6   : >> { %v396_v39 = vpop.permute.xlu0 %395  ;;  %v1804_v40 = vmul.f32 %v429_v38, %v1737_v14  ;;  %v1833_v50 = vmul.f32 %v569_v49, %v1737_v14 }
  0xa7   : >> { %v1807_v41 = vmul.f32 %v396_v39, %v1737_v14 }
  0xa8   : >> { %1312 = vset.pattern.permute.xlu2 %v1545_v25 }
  0xa9   : >> { %401 = vperm.xlu1 %1309, %v1807_v41   ;;  %434 = vperm.xlu2 %1312, %v1804_v40  }
  0xad   : >> { %v509_v51 = vpop.permute.xlu1 %508 }
  0xae   : >> { %v440_v42 = vpop.permute.xlu0 %439  ;;  %vm1903_vm3 = vcmp.eq.s32.totalorder %v509_v51, %v1647_v1 }
  0xaf   : >> { %v442_v43 = vmul.f32 %v440_v42, %v1737_v14 }
  0xb1   : >> { %1313 = vset.pattern.permute.xlu1 %v1546_v44  ;;  %1316 = vset.pattern.permute.xlu2 %v1543_v19 }
  0xb2   : >> { %445 = vperm.xlu1 %1313, %v442_v43   ;;  %484 = vperm.xlu2 %1316, %v1807_v41  }
  0xb6   : >> { %v455_v45 = vpop.permute.xlu0 %454 }
  0xb7   : >> { %v1817_v46 = vmul.f32 %v455_v45, %v1737_v14  ;;  %v566_v53 = vpop.permute.xlu1 %565 }
  0xb8   : >> { %vm1851_vm2 = vcmp.eq.s32.totalorder %v566_v53, %v1647_v1 }
  0xb9   : >> { %586 = vperm.xlu0 %1350, %v1817_v46  }
  0xba   : >> { %1314 = vset.pattern.permute.xlu1 %v1529_v11  ;;  %1318 = vset.pattern.permute.xlu2 %v1545_v25 }
  0xbb   : >> { %460 = vperm.xlu1 %1314, %v1817_v46   ;;  %496 = vperm.xlu2 %1318, %v1783_v32  }
  0xbf   : >> { %v1855_v56 = vpop.permute.xlu1 %592 }
  0xc0   : >> { %v595_v57 = vsel %vm1851_vm2, %v1855_v56, 0.0 }
  0xc1   : >> { %643 = vperm.xlu0 %1350, %v1825_v48  }
  0xc3   : >> { %1315 = vset.pattern.permute.xlu1 %v1542_v18  ;;  %1320 = vset.pattern.permute.xlu2 %v1532_v15 }
  0xc4   : >> { %478 = vperm.xlu1 %1315, %v1762_v21   ;;  %523 = vperm.xlu2 %1320, %v1817_v46  }
  0xc9   : >> { %700 = vperm.xlu0 %1350, %v1833_v50  }
  0xcc   : >> { %1317 = vset.pattern.permute.xlu1 %v1544_v24  ;;  %1322 = vset.pattern.permute.xlu2 %v1543_v19 }
  0xcd   : >> { %490 = vperm.xlu1 %1317, %v1766_v23   ;;  %541 = vperm.xlu2 %1322, %v1762_v21  }
  0xd5   : >> { %1319 = vset.pattern.permute.xlu1 %v1529_v11  ;;  %1324 = vset.pattern.permute.xlu2 %v1545_v25 }
  0xd6   : >> { %517 = vperm.xlu1 %1319, %v1825_v48   ;;  %553 = vperm.xlu2 %1324, %v1766_v23  }
  0xda   : >> { %v391_v52 = vpop.permute.xlu2 %390 }
  0xdb   : >> { %v393_v54 = vsel %vm1778_vm0, %v391_v52, 0.0 }
  0xdc   : >> { %v394_v20 = vmax.f32 %v1514_v8, %v393_v54 }
  0xde   : >> { %1321 = vset.pattern.permute.xlu1 %v1542_v18  ;;  %1326 = vset.pattern.permute.xlu2 %v1532_v15 }
  0xdf   : >> { %535 = vperm.xlu1 %1321, %v1773_v27   ;;  %580 = vperm.xlu2 %1326, %v1825_v48  }
  0xe7   : >> { %1323 = vset.pattern.permute.xlu1 %v1544_v24  ;;  %1327 = vset.pattern.permute.xlu2 %v1543_v19 }
  0xe8   : >> { %547 = vperm.xlu1 %1323, %v1807_v41   ;;  %598 = vperm.xlu2 %1327, %v1773_v27  }
  0xf0   : >> { %1325 = vset.pattern.permute.xlu1 %v1529_v11  ;;  %1329 = vset.pattern.permute.xlu2 %v1545_v25 }
  0xf1   : >> { %574 = vperm.xlu1 %1325, %v1833_v50   ;;  %610 = vperm.xlu2 %1329, %v1807_v41  }
  0xf9   : >> { %1328 = vset.pattern.permute.xlu1 %v1544_v24  ;;  %625 = vrot.lane.b32.xlu2 %v1720_v12, %s1547_s21 }
  0xfa   : >> { %604 = vperm.xlu1 %1328, %v1762_v21   ;;  %v1871_v58 = vpop.permute.xlu2 %423  ;;  %v413_v59 = vpop.permute.xlu0 %412  ;;  %1332 = vset.pattern.permute.xlu2 %v1532_v15 }
  0xfb   : >> { %v426_v60 = vsel %vm1778_vm0, %v1871_v58, 0.0  ;;  %v415_v61 = vsel %vm1778_vm0, %v413_v59, 0.0 }
  0xfc   : >> { %v416_v22 = vmax.f32 %v1506_v6, %v415_v61 }
 0x101   : >> { %637 = vperm.xlu2 %1332, %v1833_v50  }
 0x102   : >> { %1330 = vset.pattern.permute.xlu1 %v1543_v19 }
 0x103   : >> { %622 = vperm.xlu1 %1330, %v1734_v13   ;;  %v435_v62 = vpop.permute.xlu2 %434  ;;  %v1882_v63 = vpop.permute.xlu0 %781 }
 0x104   : >> { %v437_v0 = vsel %vm1778_vm0, %v435_v62, 0.0 }
 0x109   : >> { %1334 = vset.pattern.permute.xlu2 %v1543_v19 }
 0x10a   : >> { %v380_v2 = vpop.permute.xlu1 %379  ;;  %655 = vperm.xlu2 %1334, %v1742_v16  }
 0x10b   : >> { %v382_v17 = vsel %vm1778_vm0, %v380_v2, 0.0  ;;  %1331 = vset.pattern.permute.xlu1 %v1529_v11 }
 0x10c   : >> { %v383_v26 = vmax.f32 %v1518_v9, %v382_v17  ;;  %v485_v28 = vpop.permute.xlu2 %484  ;;  %v473_v29 = vpop.permute.xlu0 %472  ;;  %v438_v9 = vmax.f32 %v1498_v4, %v437_v0 }
 0x10d   : >> { %v487_v31 = vsel %vm1793_vm1, %v485_v28, 0.0  ;;  %v475_v38 = vsel %vm1793_vm1, %v473_v29, 0.0 }
 0x10e   : >> { %v488_v39 = vmax.f32 %v416_v22, %v487_v31  ;;  %v476_v42 = vmax.f32 %v394_v20, %v475_v38  ;;  %v470_v43 = vmax.f32 %v383_v26, %v469_v37  ;;  %v371_v22 = vmax.f32 %v1522_v10, %v370_v34 }
 0x112   : >> { %1336 = vset.pattern.permute.xlu2 %v1545_v25 }
 0x113   : >> { %667 = vperm.xlu2 %1336, %v1762_v21  }
 0x114   : >> { %v530_v8 = vpop.permute.xlu0 %529 }
 0x115   : >> { %v532_v45 = vsel %vm1903_vm3, %v530_v8, 0.0  ;;  %v497_v47 = vpop.permute.xlu2 %496 }
 0x116   : >> { %v533_v49 = vmax.f32 %v476_v42, %v532_v45  ;;  %v499_v36 = vsel %vm1793_vm1, %v497_v47, 0.0  ;;  %v427_v47 = vmax.f32 %v1502_v5, %v426_v60 }
 0x117   : >> { %v500_v37 = vmax.f32 %v438_v9, %v499_v36 }
 0x11b   : >> { %v402_v51 = vpop.permute.xlu1 %401  ;;  %682 = vrot.lane.b32.xlu2 %v1720_v12, %s1548_s24 }
 0x11c   : >> { %v404_v52 = vsel %vm1778_vm0, %v402_v51, 0.0  ;;  %1338 = vset.pattern.permute.xlu2 %v1532_v15 }
 0x11e   : >> { %v524_v53 = vpop.permute.xlu2 %523 }
 0x11f   : >> { %v526_v4 = vsel %vm1903_vm3, %v524_v53, 0.0 }
 0x120   : >> { %v527_v54 = vmax.f32 %v470_v43, %v526_v4  ;;  %v405_v43 = vmax.f32 %v1510_v7, %v404_v52 }
 0x124   : >> { %v1920_v59 = vpop.permute.xlu1 %445 }
 0x125   : >> { %v448_v61 = vsel %vm1778_vm0, %v1920_v59, 0.0 }
 0x127   : >> { %v542_v62 = vpop.permute.xlu2 %541 }
 0x128   : >> { %v544_v0 = vsel %vm1903_vm3, %v542_v62, 0.0 }
 0x129   : >> { %v545_v2 = vmax.f32 %v488_v39, %v544_v0 }
 0x12b   : >> { %v587_v17 = vpop.permute.xlu0 %586 }
 0x12c   : >> { %v589_v20 = vsel %vm1851_vm2, %v587_v17, 0.0 }
 0x12d   : >> { %v1934_v26 = vmax.f32 %v533_v49, %v589_v20  ;;  %v461_v28 = vpop.permute.xlu1 %460 }
 0x12e   : >> { %v463_v29 = vsel %vm1793_vm1, %v461_v28, 0.0 }
 0x12f   : >> { %v464_v31 = vmax.f32 %v371_v22, %v463_v29 }
 0x130   : >> { %v554_v38 = vpop.permute.xlu2 %553 }
 0x131   : >> { %v556_v39 = vsel %vm1903_vm3, %v554_v38, 0.0 }
 0x132   : >> { %v557_v42 = vmax.f32 %v500_v37, %v556_v39 }
 0x136   : >> { %v479_v8 = vpop.permute.xlu1 %478 }
 0x137   : >> { %v481_v33 = vsel %vm1793_vm1, %v479_v8, 0.0 }
 0x138   : >> { %v482_v9 = vmax.f32 %v405_v43, %v481_v33 }
 0x139   : >> { %v581_v10 = vpop.permute.xlu2 %580 }
 0x13a   : >> { %v583_v34 = vsel %vm1851_vm2, %v581_v10, 0.0 }
 0x13b   : >> { %v584_v45 = vmax.f32 %v527_v54, %v583_v34 }
 0x13f   : >> { %v491_v49 = vpop.permute.xlu1 %490 }
 0x140   : >> { %v493_v7 = vsel %vm1793_vm1, %v491_v49, 0.0 }
 0x141   : >> { %v494_v36 = vmax.f32 %v427_v47, %v493_v7  ;;  %v644_v47 = vpop.permute.xlu0 %643 }
 0x142   : >> { %v599_v37 = vpop.permute.xlu2 %598 }
 0x143   : >> { %v601_v51 = vsel %vm1851_vm2, %v599_v37, 0.0 }
 0x144   : >> { %v602_v52 = vmax.f32 %v545_v2, %v601_v51 }
 0x148   : >> { %v518_v53 = vpop.permute.xlu1 %517 }
 0x149   : >> { %v520_v4 = vsel %vm1903_vm3, %v518_v53, 0.0 }
 0x14a   : >> { %v521_v54 = vmax.f32 %v464_v31, %v520_v4 }
 0x14b   : >> { %v611_v62 = vpop.permute.xlu2 %610 }
 0x14c   : >> { %v613_v58 = vsel %vm1851_vm2, %v611_v62, 0.0 }
 0x14d   : >> { %v614_v5 = vmax.f32 %v557_v42, %v613_v58 }
 0x151   : >> { %v536_v60 = vpop.permute.xlu1 %535 }
 0x152   : >> { %v538_v0 = vsel %vm1903_vm3, %v536_v60, 0.0 }
 0x153   : >> { %v539_v17 = vmax.f32 %v482_v9, %v538_v0  ;;  %v626_v20 = vpop.permute.xlu2 %625 }
 0x154   : >> { %v1961_v22 = vmul.f32 %v626_v20, %v1737_v14 }
 0x155   : >> { %v1967_v2 = vmax.f32 %v539_v17, %v595_v57 }
 0x156   : >> { %757 = vperm.xlu0 %1350, %v1961_v22   ;;  %694 = vperm.xlu2 %1338, %v1961_v22  }
 0x157   : >> { %631 = vperm.xlu1 %1331, %v1961_v22  }
 0x15a   : >> { %v548_v28 = vpop.permute.xlu1 %547 }
 0x15b   : >> { %v550_v29 = vsel %vm1903_vm3, %v548_v28, 0.0  ;;  %v638_v38 = vpop.permute.xlu2 %637 }
 0x15c   : >> { %v551_v31 = vmax.f32 %v494_v36, %v550_v29 }
 0x15e   : >> { %1340 = vset.pattern.permute.xlu2 %v1543_v19 }
 0x15f   : >> { %1333 = vset.pattern.permute.xlu1 %v1542_v18  ;;  %712 = vperm.xlu2 %1340, %v1817_v46  }
 0x160   : >> { %649 = vperm.xlu1 %1333, %v1817_v46  }
 0x163   : >> { %v575_v56 = vpop.permute.xlu1 %574 }
 0x164   : >> { %v577_v57 = vsel %vm1851_vm2, %v575_v56, 0.0  ;;  %v656_v39 = vpop.permute.xlu2 %655 }
 0x165   : >> { %v578_v42 = vmax.f32 %v521_v54, %v577_v57 }
 0x167   : >> { %1342 = vset.pattern.permute.xlu2 %v1545_v25 }
 0x168   : >> { %1335 = vset.pattern.permute.xlu1 %v1544_v24  ;;  %724 = vperm.xlu2 %1342, %v1773_v27  }
 0x169   : >> { %661 = vperm.xlu1 %1335, %v1773_v27  }
 0x16c   : >> { %v605_v43 = vpop.permute.xlu1 %604 }
 0x16d   : >> { %v607_v8 = vsel %vm1851_vm2, %v605_v43, 0.0  ;;  %v668_v33 = vpop.permute.xlu2 %667 }
 0x16e   : >> { %v1986_v9 = vmax.f32 %v551_v31, %v607_v8 }
 0x170   : >> { %739 = vrot.lane.b32.xlu2 %v1720_v12, %s1549_s28 }
 0x171   : >> { %679 = vperm.xlu1 %1335, %v1734_v13   ;;  %1345 = vset.pattern.permute.xlu2 %v1532_v15 }
 0x175   : >> { %v623_v10 = vpop.permute.xlu1 %622  ;;  %v683_v34 = vpop.permute.xlu2 %682 }
 0x176   : >> { %vm1992_vm4 = vcmp.eq.s32.totalorder %v623_v10, %v1647_v1  ;;  %v685_v7 = vmul.f32 %v683_v34, %v1737_v14 }
 0x177   : >> { %v646_v36 = vsel %vm1992_vm4, %v644_v47, 0.0  ;;  %v640_v37 = vsel %vm1992_vm4, %v638_v38, 0.0  ;;  %v670_v51 = vsel %vm1992_vm4, %v668_v33, 0.0  ;;  %v658_v53 = vsel %vm1992_vm4, %v656_v39, 0.0 }
 0x178   : >> { %v647_v4 = vmax.f32 %v1934_v26, %v646_v36  ;;  %814 = vperm.xlu0 %1350, %v685_v7   ;;  %751 = vperm.xlu2 %1345, %v685_v7   ;;  %v641_v54 = vmax.f32 %v584_v45, %v640_v37  ;;  %v671_v62 = vmax.f32 %v614_v5, %v670_v51 }
 0x179   : >> { %1337 = vset.pattern.permute.xlu1 %v1529_v11  ;;  %v659_v58 = vmax.f32 %v602_v52, %v658_v53 }
 0x17a   : >> { %688 = vperm.xlu1 %1337, %v685_v7  }
 0x180   : >> { %1355 = vset.pattern.permute.xlu0 %v1546_v44  ;;  %796 = vrot.lane.b32.xlu2 %v1720_v12, %s1550_s29 }
 0x181   : >> { %502 = vperm.xlu0 %1355, %v1804_v40   ;;  %1348 = vset.pattern.permute.xlu2 %v1544_v24 }
 0x182   : >> { %1339 = vset.pattern.permute.xlu1 %v1542_v18 }
 0x183   : >> { %706 = vperm.xlu1 %1339, %v1825_v48  }
 0x188   : >> { %775 = vperm.xlu2 %1348, %v1817_v46  }
 0x189   : >> { %559 = vperm.xlu0 %1355, %v1783_v32  }
 0x18b   : >> { %1341 = vset.pattern.permute.xlu1 %v1544_v24 }
 0x18c   : >> { %718 = vperm.xlu1 %1341, %v1742_v16  }
 0x190   : >> { %1352 = vset.pattern.permute.xlu2 %v1546_v44 }
 0x191   : >> { %616 = vperm.xlu0 %1355, %v1766_v23   ;;  %793 = vperm.xlu2 %1352, %v1734_v13  }
 0x194   : >> { %1343 = vset.pattern.permute.xlu1 %v1545_v25 }
 0x195   : >> { %736 = vperm.xlu1 %1343, %v1734_v13  }
 0x199   : >> { %673 = vperm.xlu0 %1355, %v1807_v41   ;;  %1354 = vset.pattern.permute.xlu2 %v1532_v15 }
 0x19d   : >> { %1344 = vset.pattern.permute.xlu1 %v1529_v11 }
 0x1a1   : >> { %730 = vperm.xlu0 %1355, %v1762_v21  }
 0x1a9   : >> { %844 = vperm.xlu0 %1355, %v1742_v16   ;;  %v701_v16 = vpop.permute.xlu0 %700 }
 0x1b0   : >> { %v695_v12 = vpop.permute.xlu2 %694 }
 0x1b9   : >> { %v713_v32 = vpop.permute.xlu2 %712 }
 0x1c2   : >> { %v725_v40 = vpop.permute.xlu2 %724 }
 0x1c8   : >> { %v758_v17 = vpop.permute.xlu0 %757 }
 0x1c9   : >> { %v632_v23 = vpop.permute.xlu1 %631 }
 0x1ca   : >> { %v634_v26 = vsel %vm1992_vm4, %v632_v23, 0.0  ;;  %v740_v45 = vpop.permute.xlu2 %739 }
 0x1cb   : >> { %v635_v52 = vmax.f32 %v578_v42, %v634_v26  ;;  %v742_v13 = vmul.f32 %v740_v45, %v1737_v14 }
 0x1cd   : >> { %808 = vperm.xlu2 %1354, %v742_v13   ;;  %745 = vperm.xlu1 %1344, %v742_v13  }
 0x1d2   : >> { %v650_v15 = vpop.permute.xlu1 %649  ;;  %v752_v20 = vpop.permute.xlu2 %751 }
 0x1d3   : >> { %v652_v41 = vsel %vm1992_vm4, %v650_v15, 0.0 }
 0x1d4   : >> { %v653_v21 = vmax.f32 %v1967_v2, %v652_v41 }
 0x1d5   : >> { %1357 = vset.pattern.permute.xlu2 %v1543_v19  ;;  %1346 = vset.pattern.permute.xlu1 %v1542_v18 }
 0x1d6   : >> { %826 = vperm.xlu2 %1357, %v1833_v50   ;;  %763 = vperm.xlu1 %1346, %v1833_v50  }
 0x1da   : >> { %v797_v39 = vpop.permute.xlu2 %796 }
 0x1db   : >> { %v662_v5 = vpop.permute.xlu1 %661  ;;  %v799_v43 = vmul.f32 %v797_v39, %v1737_v14 }
 0x1dc   : >> { %v664_v60 = vsel %vm1992_vm4, %v662_v5, 0.0 }
 0x1dd   : >> { %v665_v0 = vmax.f32 %v1986_v9, %v664_v60 }
 0x1de   : >> { %1359 = vset.pattern.permute.xlu2 %v1545_v25  ;;  %1347 = vset.pattern.permute.xlu1 %v1543_v19 }
 0x1df   : >> { %838 = vperm.xlu2 %1359, %v1817_v46   ;;  %769 = vperm.xlu1 %1347, %v1825_v48  }
 0x1e2   : >> { %v776_v59 = vpop.permute.xlu2 %775 }
 0x1e3   : >> { %v680_v2 = vpop.permute.xlu1 %679 }
 0x1e4   : >> { %vm2045_vm5 = vcmp.eq.s32.totalorder %v680_v2, %v1647_v1 }
 0x1e5   : >> { %v703_v28 = vsel %vm2045_vm5, %v701_v16, 0.0  ;;  %v697_v25 = vsel %vm2045_vm5, %v695_v12, 0.0  ;;  %v727_v19 = vsel %vm2045_vm5, %v725_v40, 0.0  ;;  %v715_v46 = vsel %vm2045_vm5, %v713_v32, 0.0 }
 0x1e6   : >> { %v704_v29 = vmax.f32 %v647_v4, %v703_v28  ;;  %v698_v31 = vmax.f32 %v641_v54, %v697_v25  ;;  %v728_v38 = vmax.f32 %v671_v62, %v727_v19  ;;  %v716_v56 = vmax.f32 %v659_v58, %v715_v46 }
 0x1e7   : >> { %1351 = vset.pattern.permute.xlu1 %v1546_v44  ;;  %v449_v44 = vmax.f32 %v1494_v3, %v448_v61 }
 0x1e8   : >> { %787 = vperm.xlu1 %1351, %v1773_v27  }
 0x1ea   : >> { %v815_v57 = vpop.permute.xlu0 %814 }
 0x1ec   : >> { %v689_v42 = vpop.permute.xlu1 %688 }
 0x1ed   : >> { %v691_v8 = vsel %vm2045_vm5, %v689_v42, 0.0 }
 0x1ee   : >> { %v2062_v33 = vmax.f32 %v635_v52, %v691_v8 }
 0x1f0   : >> { %1353 = vset.pattern.permute.xlu1 %v1529_v11 }
 0x1f1   : >> { %802 = vperm.xlu1 %1353, %v799_v43  }
 0x1f3   : >> { %v503_v27 = vpop.permute.xlu0 %502 }
 0x1f4   : >> { %v505_v9 = vsel %vm1793_vm1, %v503_v27, 0.0 }
 0x1f5   : >> { %v506_v10 = vmax.f32 %v449_v44, %v505_v9  ;;  %v707_v14 = vpop.permute.xlu1 %706 }
 0x1f6   : >> { %v709_v34 = vsel %vm2045_vm5, %v707_v14, 0.0 }
 0x1f7   : >> { %v710_v47 = vmax.f32 %v653_v21, %v709_v34 }
 0x1f9   : >> { %1356 = vset.pattern.permute.xlu1 %v1542_v18 }
 0x1fa   : >> { %820 = vperm.xlu1 %1356, %v1961_v22   ;;  %v794_v22 = vpop.permute.xlu2 %793 }
 0x1fb   : >> { %v560_v11 = vpop.permute.xlu0 %559  ;;  %vm2085_vm6 = vcmp.eq.s32.totalorder %v794_v22, %v1647_v1 }
 0x1fc   : >> { %v562_v30 = vsel %vm1903_vm3, %v560_v11, 0.0  ;;  %v817_v54 = vsel %vm2085_vm6, %v815_v57, 0.0 }
 0x1fd   : >> { %v563_v3 = vmax.f32 %v506_v10, %v562_v30 }
 0x1fe   : >> { %v719_v61 = vpop.permute.xlu1 %718 }
 0x1ff   : >> { %v721_v35 = vsel %vm2045_vm5, %v719_v61, 0.0 }
 0x200   : >> { %v722_v7 = vmax.f32 %v665_v0, %v721_v35 }
 0x202   : >> { %1358 = vset.pattern.permute.xlu1 %v1544_v24 }
 0x203   : >> { %832 = vperm.xlu1 %1358, %v1825_v48   ;;  %v617_v36 = vpop.permute.xlu0 %616 }
 0x204   : >> { %v619_v18 = vsel %vm1851_vm2, %v617_v36, 0.0 }
 0x205   : >> { %v620_v37 = vmax.f32 %v563_v3, %v619_v18 }
 0x207   : >> { %v737_v51 = vpop.permute.xlu1 %736 }
 0x208   : >> { %vm2090_vm7 = vcmp.eq.s32.totalorder %v737_v51, %v1647_v1 }
 0x209   : >> { %v760_v24 = vsel %vm2090_vm7, %v758_v17, 0.0  ;;  %v754_v48 = vsel %vm2090_vm7, %v752_v20, 0.0  ;;  %v784_v41 = vsel %vm2090_vm7, %v1882_v63, 0.0  ;;  %v778_v9 = vsel %vm2090_vm7, %v776_v59, 0.0 }
 0x20a   : >> { %v761_v55 = vmax.f32 %v704_v29, %v760_v24  ;;  %v755_v4 = vmax.f32 %v698_v31, %v754_v48  ;;  %v785_v16 = vmax.f32 %v728_v38, %v784_v41  ;;  %v779_v34 = vmax.f32 %v722_v7, %v778_v9 }
 0x20b   : >> { %v674_v62 = vpop.permute.xlu0 %673 }
 0x20c   : >> { %v2100_v8 = vmax.f32 %v761_v55, %v817_v54   ;;  %v676_v12 = vsel %vm1992_vm4, %v674_v62, 0.0 }
 0x20d   : >> { %v677_v32 = vmax.f32 %v620_v37, %v676_v12 }
 0x20e   : >> { %v2235_v58 = vmov %v2100_v8 }
 0x20f   : > { %v861_v59 = vrot.slane (%p341_p0), %v2235_v58, 4 }
 0x211   : > { %v862_v53 = vmax.f32 (%p341_p0), %v2235_v58, %v861_v59 }
 0x213   : >> { %v731_v40 = vpop.permute.xlu0 %730 }
 0x214   : >> { %v733_v23 = vsel %vm2045_vm5, %v731_v40, 0.0 }
 0x215   : >> { %v734_v26 = vmax.f32 %v677_v32, %v733_v23 }
 0x21b   : >> { %v845_v25 = vpop.permute.xlu0 %844 }
 0x21c   : >> { %v847_v29 = vsel %vm2085_vm6, %v845_v25, 0.0 }
 0x227   : >> { %v809_v45 = vpop.permute.xlu2 %808 }
 0x228   : >> { %v811_v52 = vsel %vm2085_vm6, %v809_v45, 0.0 }
 0x229   : >> { %v812_v13 = vmax.f32 %v755_v4, %v811_v52  }
 0x22b   : >> { %v2242_v9 = vmov %v812_v13  ;;  %v855_v30 = vrot.slane (%p341_p0), %v812_v13, 4 }
 0x22d   : > { %v856_v51 = vmax.f32 (%p341_p0), %v812_v13, %v855_v30 }
 0x22f   : > { %v857_v1 = vrot.slane (%p341_p0), %v856_v51, 2 }
 0x230   : >> { %v827_v15 = vpop.permute.xlu2 %826 }
 0x231   : >> { %v829_v50 = vsel %vm2085_vm6, %v827_v15, 0.0 }
 0x239   : >> { %v839_v21 = vpop.permute.xlu2 %838 }
 0x23a   : >> { %v841_v49 = vsel %vm2085_vm6, %v839_v21, 0.0 }
 0x23b   : >> { %v842_v60 = vmax.f32 %v785_v16, %v841_v49  }
 0x23d   : >> { %v2237_v4 = vmov %v842_v60  ;;  %v885_v18 = vrot.slane (%p341_p0), %v842_v60, 4 }
 0x23f   : >> { %v746_v5 = vpop.permute.xlu1 %745  ;;  %v886_v54 = vmax.f32 (%p341_p0), %v842_v60, %v885_v18 }
 0x240   : >> { %v748_v38 = vsel %vm2090_vm7, %v746_v5, 0.0 }
 0x241   : >> { %v749_v57 = vmax.f32 %v2062_v33, %v748_v38  ;;  %v887_v32 = vrot.slane (%p341_p0), %v886_v54, 2 }
 0x243   : > { %v888_v15 = vmax.f32 (%p341_p0), %v886_v54, %v887_v32 }
 0x248   : >> { %v764_v0 = vpop.permute.xlu1 %763 }
 0x249   : >> { %v766_v43 = vsel %vm2090_vm7, %v764_v0, 0.0 }
 0x24a   : >> { %v767_v8 = vmax.f32 %v710_v47, %v766_v43 }
 0x251   : >> { %v770_v17 = vpop.permute.xlu1 %769 }
 0x252   : >> { %v772_v20 = vsel %vm2090_vm7, %v770_v17, 0.0 }
 0x253   : >> { %v773_v2 = vmax.f32 %v716_v56, %v772_v20 }
 0x255   : >> { %v830_v28 = vmax.f32 %v773_v2, %v829_v50   ;;  %v889_v50 = vrot.slane (%p341_p0), %v888_v15, 1 }
 0x257   : >> { %v2239_v6 = vmov %v830_v28  ;;  %v873_v35 = vrot.slane (%p341_p0), %v830_v28, 4 }
 0x259   : > { %v874_v48 = vmax.f32 (%p341_p0), %v830_v28, %v873_v35 }
 0x25a   : >> { %v788_v19 = vpop.permute.xlu1 %787 }
 0x25b   : >> { %v790_v63 = vsel %vm2090_vm7, %v788_v19, 0.0  ;;  %v875_v6 = vrot.slane (%p341_p0), %v874_v48, 2 }
 0x25c   : >> { %v791_v46 = vmax.f32 %v734_v26, %v790_v63  ;;  %v858_v26 = vmax.f32 (%p341_p0), %v856_v51, %v857_v1 }
 0x25e   : >> { %v848_v31 = vmax.f32 %v791_v46, %v847_v29   ;;  %v859_v16 = vrot.slane (%p341_p0), %v858_v26, 1  ;;  %v890_v29 = vmax.f32 (%p341_p0), %v888_v15, %v889_v50 }
 0x260   : >> { %v2236_v3 = vmov %v848_v31  ;;  %v891_v22 = vrot.slane (%p341_p0), %v848_v31, 4  ;;  %v860_v20 = vmax.f32 (%p341_p0), %v858_v26, %v859_v16 }
 0x261   : > { %v863_v3 = vrot.slane (%p341_p0), %v862_v53, 2 }
 0x262   : > { %v892_v62 = vmax.f32 (%p341_p0), %v848_v31, %v891_v22 }
 0x263   : >> { %v803_v56 = vpop.permute.xlu1 %802  ;;  %v864_v45 = vmax.f32 (%p341_p0), %v862_v53, %v863_v3 }
 0x264   : >> { %v805_v39 = vsel %vm2085_vm6, %v803_v56, 0.0  ;;  %v893_v40 = vrot.slane (%p341_p0), %v892_v62, 2 }
 0x265   : >> { %v806_v42 = vmax.f32 %v749_v57, %v805_v39   ;;  %v865_v49 = vrot.slane (%p341_p0), %v864_v45, 1  ;;  %v897_v39 = vld [vmem:[%s1650_s7] sm:$0xff] (%p341_p0) }
 0x266   : > { %v894_v41 = vmax.f32 (%p341_p0), %v892_v62, %v893_v40 }
 0x267   : > { %v849_v47 = vrot.slane (%p341_p0), %v806_v42, 4  ;;  %v866_v2 = vmax.f32 (%p341_p0), %v864_v45, %v865_v49 }
 0x268   : > { %v895_v25 = vrot.slane (%p341_p0), %v894_v41, 1 }
 0x269   : > { %v850_v37 = vmax.f32 (%p341_p0), %v806_v42, %v849_v47 }
 0x26a   : > { %v896_v38 = vmax.f32 (%p341_p0), %v894_v41, %v895_v25 }
 0x26b   : > { %v851_v12 = vrot.slane (%p341_p0), %v850_v37, 2 }
 0x26c   : >> { %v821_v44 = vpop.permute.xlu1 %820 }
 0x26d   : >> { %v823_v27 = vsel %vm2085_vm6, %v821_v44, 0.0  ;;  %v852_v23 = vmax.f32 (%p341_p0), %v850_v37, %v851_v12 }
 0x26e   : >> { %v824_v14 = vmax.f32 %v767_v8, %v823_v27   ;;  %v2241_v8 = vmov %v2235_v58  ;;  %v876_v58 = vmax.f32 (%p341_p0), %v874_v48, %v875_v6 }
 0x26f   : > { %v853_v21 = vrot.slane (%p341_p0), %v852_v23, 1 }
 0x270   : >> { %v2240_v7 = vmov %v824_v14  ;;  %v867_v61 = vrot.slane (%p341_p0), %v824_v14, 4 }
 0x271   : > { %v854_v17 = vmax.f32 (%p341_p0), %v852_v23, %v853_v21 }
 0x272   : > { %v868_v24 = vmax.f32 (%p341_p0), %v824_v14, %v867_v61 }
 0x273   : > { %v907_v46 = vsel (%p341_p0), %vm906_vm8, %v860_v20, %v854_v17 }
 0x274   : > { %v869_v7 = vrot.slane (%p341_p0), %v868_v24, 2  ;;  %v909_v31 = vsel (%p341_p0), %vm908_vm9, %v866_v2, %v907_v46 }
 0x275   : >> { %v833_v10 = vpop.permute.xlu1 %832  ;;  %343 = sbr.rel (!%p341_p0) target bundleno = 32 (0x20), region = 87 }
 0x276   : >> { %v835_v33 = vsel %vm2085_vm6, %v833_v10, 0.0  ;;  %v2243_v10 = vmov %v806_v42  ;;  %v870_v52 = vmax.f32 (%p341_p0), %v868_v24, %v869_v7 }
 0x277   : >> { %v836_v11 = vmax.f32 %v779_v34, %v835_v33  }
 0x278   : > { %v871_v60 = vrot.slane (%p341_p0), %v870_v52, 1 }
 0x279   : >> { %v2238_v5 = vmov %v836_v11  ;;  %v879_v36 = vrot.slane (%p341_p0), %v836_v11, 4 }
 0x27a   : > { %v877_v5 = vrot.slane %v876_v58, 1  ;;  %v872_v28 = vmax.f32 %v870_v52, %v871_v60 }
 0x27b   : > { %v880_v55 = vmax.f32 %v836_v11, %v879_v36 }
 0x27c   : > { %v878_v19 = vmax.f32 %v876_v58, %v877_v5  ;;  %v911_v57 = vsel %vm910_vm10, %v872_v28, %v909_v31 }
 0x27d   : > { %v881_v4 = vrot.slane %v880_v55, 2 }
 0x27e   : > { %v913_v56 = vsel %vm912_vm11, %v878_v19, %v911_v57 }
 0x27f   : > { %v882_v13 = vmax.f32 %v880_v55, %v881_v4 }
 0x281   : > { %v883_v0 = vrot.slane %v882_v13, 1 }
 0x283   : > { %v884_v63 = vmax.f32 %v882_v13, %v883_v0 }
 0x285   : > { %v915_v42 = vsel %vm914_vm12, %v884_v63, %v913_v56 }
 0x286   : > { %v917_v43 = vsel %vm916_vm13, %v890_v29, %v915_v42 }
 0x287   : > { %v919_v8 = vsel %vm918_vm14, %v896_v38, %v917_v43 }
 0x288   : > { %v921_v44 = vmax.f32 %v897_v39, %v919_v8 }
 0x28a   : > { %922 = vst [vmem:[%s1650_s7] sm:$0xff] %v921_v44 }
 0x28b   : > { %1387 = shalt.err (!%p1384_p9)
}
 0x28c   : > { %1137 = dma.vmem_to_hbm [thread:$0]  (%p1622_p3), %s940_s6, 128, %s942_s23, %s924_s17  }
 0x28d PF: > { %p1143_p10 = scmp.ge.s32.totalorder %s1490_s19, 2  ;;  %s953_s7 = sand.u32 1, %s1462_s12  }
 0x28e   : > { %s954_s28 = scalar_lea.sflag [#allocation3], %s953_s7 }
 0x28f   : > { %p1140_p11 = pnand %p1143_p10, %p1631_p8 }
 0x291   : > { %p1141_p12 = pneg %p1140_p11 }
 0x293   : > { %1457 = dma.done.wait (%p1141_p12), %s954_s28, 128  }
 0x294   : > { %1459 = vsyncadd (%p1141_p12), %s954_s28, 4294967168  ;;  %s16_s19 = sadd.s32 1, %s1490_s19   ;;  %s2245_s15 = sld [smem:[#allocation5_spill]] }
 0x295   : > { %p13_p13 = scmp.ge.s32.totalorder %s16_s19, 10   ;;  %s2246_s16 = sld [smem:[#allocation6_spill]] }
 0x296   : > { %s2247_s17 = sld [smem:[#allocation7_spill]]  ;;  %s2249_s12 = smov %s1466_s13 }
 0x297   : > { %s2248_s18 = sld [smem:[#allocation8_spill]]  ;;  %s2250_s13 = smov %s1470_s14 }
 0x298   : > { %s2251_s14 = smov %s1640_s30  ;;  %15 = sbr.rel (!%p13_p13) target bundleno = 5 (0x5), region = 98 }
 0x29d   :  { %960 = vsyncpa [#allocation3], 1 }
 0x29e   :  { %962 = vsyncpa [#allocation3 + $0x1], 1 }

</bundles_post_ra>
